<compile_context>
chip_gen: v6e
topology: v6e:2x2x1
jax: 0.10.0
libtpu: 0.0.40
codegen_flags: <defaults>
</compile_context>

<pallas_src>
import math

import numpy as np

import jax
import jax.numpy as jnp
from jax.experimental import pallas as pl
from jax.experimental.pallas import tpu as pltpu

_SQRT1_2 = 0.7071067811865476
_BN_EPS = 1e-5


def _erf(x):
    # Abramowitz & Stegun 7.1.26 (max abs err ~1.5e-7), VPU/EUP-only ops.
    a1, a2, a3 = 0.254829592, -0.284496736, 1.421413741
    a4, a5, p = -1.453152027, 1.061405429, 0.3275911
    sign = jnp.where(x >= 0.0, 1.0, -1.0)
    ax = jnp.abs(x)
    t = 1.0 / (1.0 + p * ax)
    poly = ((((a5 * t + a4) * t + a3) * t + a2) * t + a1) * t
    return sign * (1.0 - poly * jnp.exp(-ax * ax))


def _gelu_exact(x):
    # nn.GELU() default = exact (erf) GELU.
    return 0.5 * x * (1.0 + _erf(x * _SQRT1_2))


def _quat_constants():
    """Constant matrices mapping a unit quaternion block (B*L, 4) to the
    packed (B*L, 12) output slab entirely on the MXU:
        out = ((q @ Lsel) * (q @ Rsel)) @ Cq12  +  ts @ Tsel
    with (q @ Lsel)[:, 4i+j] = q_j and (q @ Rsel)[:, 4i+j] = q_i, so the
    elementwise product holds every outer-product monomial q_i * q_j."""
    lsel = np.zeros((4, 16), np.float32)
    rsel = np.zeros((4, 16), np.float32)
    for i in range(4):
        for j in range(4):
            lsel[j, 4 * i + j] = 1.0
            rsel[i, 4 * i + j] = 1.0

    c = np.zeros((16, 12), np.float32)     # rotation in cols 0:9, zeros 9:12

    def put(col, terms):
        for (i, j, v) in terms:
            c[4 * i + j, col] += v

    # q = (a, b, c, d); row-major 3x3 rotation (standard convention).
    put(0, [(0, 0, 1), (1, 1, 1), (2, 2, -1), (3, 3, -1)])   # a2+b2-c2-d2
    put(1, [(1, 2, 1), (2, 1, 1), (0, 3, -1), (3, 0, -1)])   # 2(bc-ad)
    put(2, [(1, 3, 1), (3, 1, 1), (0, 2, 1), (2, 0, 1)])     # 2(bd+ac)
    put(3, [(1, 2, 1), (2, 1, 1), (0, 3, 1), (3, 0, 1)])     # 2(bc+ad)
    put(4, [(0, 0, 1), (1, 1, -1), (2, 2, 1), (3, 3, -1)])   # a2-b2+c2-d2
    put(5, [(2, 3, 1), (3, 2, 1), (0, 1, -1), (1, 0, -1)])   # 2(cd-ab)
    put(6, [(1, 3, 1), (3, 1, 1), (0, 2, -1), (2, 0, -1)])   # 2(bd-ac)
    put(7, [(2, 3, 1), (3, 2, 1), (0, 1, 1), (1, 0, 1)])     # 2(cd+ab)
    put(8, [(0, 0, 1), (1, 1, -1), (2, 2, -1), (3, 3, 1)])   # a2-b2-c2+d2

    tsel = np.zeros((3, 12), np.float32)   # translation selector -> cols 9:12
    for j in range(3):
        tsel[j, 9 + j] = 1.0
    return (jnp.asarray(lsel), jnp.asarray(rsel),
            jnp.asarray(c), jnp.asarray(tsel))


def _shift_matrices(B, L, K):
    """(K, B*L, B*L) 0/1 matrices: S[k] @ x gives tap k of the 'same' conv on
    the flattened (B*L, C) activation, with zero padding at both sequence ends
    and no leakage across the batch boundary."""
    pad = (K - 1) // 2
    BL = B * L
    s = np.zeros((K, BL, BL), np.float32)
    for k in range(K):
        d = k - pad
        for b in range(B):
            for l in range(L):
                src = l + d
                if 0 <= src < L:
                    s[k, b * L + l, b * L + src] = 1.0
    return jnp.asarray(s)


# ---------------------------------------------------------------------------
# Single fused decoder kernel (no grid, everything VMEM-resident)
# ---------------------------------------------------------------------------
def _make_decoder_kernel(n_layers, K):
    pad = (K - 1) // 2

    def kernel(*refs):
        x_ref, s_ref = refs[0], refs[1]
        layer_refs = refs[2:2 + 3 * n_layers]
        (wh_ref, bh_ref, lsel_ref, rsel_ref,
         cq_ref, tsel_ref, o_ref) = refs[2 + 3 * n_layers:]

        x = x_ref[...].astype(jnp.float32)          # (B*L, H), channels-last
        cur = x

        for li in range(n_layers):                  # static unroll (few layers)
            w_ref = layer_refs[3 * li]              # (K, Cin, Cout)
            g_ref = layer_refs[3 * li + 1]          # (1, Cout)
            b_ref = layer_refs[3 * li + 2]          # (1, Cout)

            # Conv1d(k, 'same', bias=False): K shifted taps via constant 0/1
            # shift matrices (center tap is the identity -> skipped), each
            # contracted against its (Cin, Cout) weight slice on the MXU.
            y = None
            for k in range(K):
                if k == pad:
                    tap = cur
                else:
                    tap = jnp.dot(s_ref[k], cur,
                                  preferred_element_type=jnp.float32)
                contrib = jnp.dot(tap, w_ref[k],
                                  preferred_element_type=jnp.float32)
                y = contrib if y is None else y + contrib       # (BL, Cout)

            # BatchNorm1d (training-mode biased batch stats over (B, L)), f32.
            mu = jnp.mean(y, axis=0, keepdims=True)
            d = y - mu
            var = jnp.mean(d * d, axis=0, keepdims=True)
            y = d * jax.lax.rsqrt(var + _BN_EPS) * g_ref[...] + b_ref[...]
            cur = _gelu_exact(y)

        # Residual + folded head Linear: columns = [10*T(3) | 1 | Q(3)].
        s = x + cur
        z = (jnp.dot(s, wh_ref[...].astype(jnp.float32),
                     preferred_element_type=jnp.float32) + bh_ref[...])
        ts = z[:, 0:3]                              # translations (already x10)
        q_un = z[:, 3:7]                            # [1, qv] un-normalized

        inv_n = jax.lax.rsqrt(jnp.sum(q_un * q_un, axis=-1, keepdims=True))
        q4 = q_un * inv_n                           # unit quaternion (BL, 4)

        # Quaternion -> rotation on the MXU: outer-product monomials via two
        # constant selector matmuls, then a constant (16, 12) combination;
        # translation dropped into lanes 9:12 by a (3, 12) selector matmul.
        qa = jnp.dot(q4, lsel_ref[...], preferred_element_type=jnp.float32)
        qb = jnp.dot(q4, rsel_ref[...], preferred_element_type=jnp.float32)
        out = (jnp.dot(qa * qb, cq_ref[...], preferred_element_type=jnp.float32)
               + jnp.dot(ts, tsel_ref[...], preferred_element_type=jnp.float32))

        # One lane-dense output slab: R columns 0:9, T columns 9:12.
        o_ref[...] = out.astype(o_ref.dtype)

    return kernel


def decoder_forward(x, params):
    B, L, H = x.shape
    BL = B * L
    K = params["kernel_size"]
    layers = params["cnn_layers"]
    lsel, rsel, cq12, tsel = params["quat_consts"]

    shifts = _shift_matrices(B, L, K)               # (K, BL, BL) constants

    # Fold the *10 translation scale and the constant quaternion w=1 component
    # into a single (H, 7) head (weights 0 / bias 1 for the constant column).
    wh, bh = params["w_head"], params["b_head"]
    wh7 = jnp.concatenate(
        [wh[:, 0:3] * 10.0, jnp.zeros((H, 1), wh.dtype), wh[:, 3:6]], axis=1)
    bh7 = jnp.concatenate(
        [bh[:, 0:3] * 10.0, jnp.ones((1, 1), bh.dtype), bh[:, 3:6]], axis=1)

    inputs = [x.reshape(BL, H), shifts]
    for (w, gamma, beta) in layers:
        inputs += [w, gamma, beta]                  # (K, Cin, Cout), (1,C), (1,C)
    inputs += [wh7, bh7, lsel, rsel, cq12, tsel]

    vmem = pl.BlockSpec(memory_space=pltpu.MemorySpace.VMEM)
    out = pl.pallas_call(
        _make_decoder_kernel(len(layers), K),
        out_shape=jax.ShapeDtypeStruct((BL, 12), x.dtype),
        in_specs=[vmem] * len(inputs),
        out_specs=vmem,
    )(*inputs)

    out = out.reshape(B, L, 12)
    Rs = out[..., 0:9].reshape(B, L, 3, 3)
    Tout = out[..., 9:12][..., None]                # == Ts[..., None]
    return Rs, Tout


# ---------------------------------------------------------------------------
# Parameters + plain-JAX (XLA) reference of the same forward pass
# ---------------------------------------------------------------------------
def init_params(key, hidden_size, channel_multipliers, kernel_size=5):
    channels = [hidden_size] + list(channel_multipliers) + [hidden_size]
    keys = jax.random.split(key, len(channels) + 1)
    cnn_layers = []
    for i in range(len(channels) - 1):
        cin, cout = channels[i], channels[i + 1]
        # Stored as (K, Cin, Cout) == PyTorch's (Cout, Cin, K) transposed.
        w = (jax.random.normal(keys[i], (kernel_size, cin, cout), jnp.float32)
             / math.sqrt(cin * kernel_size))
        gamma = jnp.ones((1, cout), jnp.float32)    # PyTorch BN default init
        beta = jnp.zeros((1, cout), jnp.float32)
        cnn_layers.append((w, gamma, beta))

    kh, kb = jax.random.split(keys[-1])
    w_head = (jax.random.normal(kh, (hidden_size, 6), jnp.float32)
              / math.sqrt(hidden_size))              # (H, 6) == torch (6, H).T
    b_head = jax.random.normal(kb, (1, 6), jnp.float32) * 0.02
    return dict(cnn_layers=cnn_layers, w_head=w_head, b_head=b_head,
                kernel_size=kernel_size, quat_consts=_quat_constants())


def decoder_reference(x, params):
    """Plain-JAX reference mirroring the PyTorch Decoder.forward semantics."""
    hi = jax.lax.Precision.HIGHEST
    B, L, H = x.shape
    K = params["kernel_size"]
    pad = (K - 1) // 2
    enc = x
    for (w, gamma, beta) in params["cnn_layers"]:
        xp = jnp.pad(enc, ((0, 0), (pad, pad), (0, 0)))
        y = sum(jnp.einsum("blc,cd->bld", xp[:, k:k + L, :], w[k], precision=hi)
                for k in range(K))
        mu = jnp.mean(y, axis=(0, 1), keepdims=True)
        var = jnp.mean((y - mu) ** 2, axis=(0, 1), keepdims=True)   # biased
        y = (y - mu) / jnp.sqrt(var + _BN_EPS) * gamma + beta
        enc = jax.nn.gelu(y, approximate=False)
    s = x + enc
    z = jnp.einsum("blh,hd->bld", s, params["w_head"], precision=hi) + params["b_head"]
    ts = z[..., 0:3] * 10.0
    qv = z[..., 3:6]
    q = jnp.concatenate([jnp.ones(qv.shape[:-1] + (1,), qv.dtype), qv], axis=-1)
    q = q / jnp.linalg.norm(q, axis=-1, keepdims=True)
    a, b, c, d = q[..., 0], q[..., 1], q[..., 2], q[..., 3]
    R = jnp.stack([
        a * a + b * b - c * c - d * d, 2 * (b * c - a * d), 2 * (b * d + a * c),
        2 * (b * c + a * d), a * a - b * b + c * c - d * d, 2 * (c * d - a * b),
        2 * (b * d - a * c), 2 * (c * d + a * b), a * a - b * b - c * c + d * d,
    ], axis=-1).reshape(B, L, 3, 3)
    return R, ts[..., None]


if __name__ == "__main__":
    key = jax.random.PRNGKey(0)
    kx, kp = jax.random.split(key)

    B, L, H = 2, 16, 32                     # hidden_size = 32, output_dim = 6
    channel_multipliers = [16]              # channels: [32, 16, 32]

    x = jax.random.normal(kx, (B, L, H), jnp.float32)
    params = init_params(kp, H, channel_multipliers)

    Rs, Tout = decoder_forward(x, params)
    jax.block_until_ready((Rs, Tout))

    assert Rs.shape == (B, L, 3, 3)
    assert Tout.shape == (B, L, 3, 1)

    # Self-check against the plain-JAX reference of the same forward pass.
    Rs_ref, T_ref = decoder_reference(x, params)
    assert bool(jnp.allclose(Rs, Rs_ref, atol=5e-3, rtol=5e-3)), "Rs mismatch"
    assert bool(jnp.allclose(Tout, T_ref, atol=5e-3, rtol=5e-3)), "T mismatch"
    # Rotation-matrix rows from unit quaternions must be unit-norm.
    row_norm = jnp.sum(Rs * Rs, axis=-1)
    assert bool(jnp.allclose(row_norm, 1.0, atol=1e-3))

    print("KERNEL_OK")
</pallas_src>

<mosaic_0001>
module attributes {stable_mosaic.version = 11 : i64} {
  func.func @kernel(%arg0: memref<32x32xf32, #tpu.memory_space<vmem>>, %arg1: memref<5x32x32xf32, #tpu.memory_space<vmem>>, %arg2: memref<5x32x16xf32, #tpu.memory_space<vmem>>, %arg3: memref<1x16xf32, #tpu.memory_space<vmem>>, %arg4: memref<1x16xf32, #tpu.memory_space<vmem>>, %arg5: memref<5x16x32xf32, #tpu.memory_space<vmem>>, %arg6: memref<1x32xf32, #tpu.memory_space<vmem>>, %arg7: memref<1x32xf32, #tpu.memory_space<vmem>>, %arg8: memref<32x7xf32, #tpu.memory_space<vmem>>, %arg9: memref<1x7xf32, #tpu.memory_space<vmem>>, %arg10: memref<4x16xf32, #tpu.memory_space<vmem>>, %arg11: memref<4x16xf32, #tpu.memory_space<vmem>>, %arg12: memref<16x12xf32, #tpu.memory_space<vmem>>, %arg13: memref<3x12xf32, #tpu.memory_space<vmem>>, %arg14: memref<32x12xf32, #tpu.memory_space<vmem>>) attributes {dimension_semantics = [], scalar_prefetch = 0 : i64, scratch_operands = 0 : i64, tpu.core_type = #tpu.core_type<tc>} {
    %c0 = arith.constant 0 : index
    %c0_0 = arith.constant 0 : index
    %0 = vector.load %arg0[%c0, %c0_0] : memref<32x32xf32, #tpu.memory_space<vmem>>, vector<32x32xf32>
    %c0_1 = arith.constant 0 : index
    %c0_2 = arith.constant 0 : index
    %c0_3 = arith.constant 0 : index
    %1 = vector.load %arg1[%c0_1, %c0_2, %c0_3] : memref<5x32x32xf32, #tpu.memory_space<vmem>>, vector<1x32x32xf32>
    %2 = vector.shape_cast %1 : vector<1x32x32xf32> to vector<32x32xf32>
    %cst = arith.constant dense<0.000000e+00> : vector<32x32xf32>
    %3 = tpu.matmul %2, %0, %cst {dimension_numbers = #tpu.dot_dimension_numbers<[1], [0], [0], [1], [0, 0, 1, 1], [], []>} : vector<32x32xf32>, vector<32x32xf32>, vector<32x32xf32> -> vector<32x32xf32>
    %c0_4 = arith.constant 0 : index
    %c0_5 = arith.constant 0 : index
    %c0_6 = arith.constant 0 : index
    %4 = vector.load %arg2[%c0_4, %c0_5, %c0_6] : memref<5x32x16xf32, #tpu.memory_space<vmem>>, vector<1x32x16xf32>
    %5 = vector.shape_cast %4 : vector<1x32x16xf32> to vector<32x16xf32>
    %cst_7 = arith.constant dense<0.000000e+00> : vector<32x16xf32>
    %6 = tpu.matmul %3, %5, %cst_7 {dimension_numbers = #tpu.dot_dimension_numbers<[1], [0], [0], [1], [0, 0, 1, 1], [], []>} : vector<32x32xf32>, vector<32x16xf32>, vector<32x16xf32> -> vector<32x16xf32>
    %c1 = arith.constant 1 : index
    %c0_8 = arith.constant 0 : index
    %c0_9 = arith.constant 0 : index
    %7 = vector.load %arg1[%c1, %c0_8, %c0_9] : memref<5x32x32xf32, #tpu.memory_space<vmem>>, vector<1x32x32xf32>
    %8 = vector.shape_cast %7 : vector<1x32x32xf32> to vector<32x32xf32>
    %cst_10 = arith.constant dense<0.000000e+00> : vector<32x32xf32>
    %9 = tpu.matmul %8, %0, %cst_10 {dimension_numbers = #tpu.dot_dimension_numbers<[1], [0], [0], [1], [0, 0, 1, 1], [], []>} : vector<32x32xf32>, vector<32x32xf32>, vector<32x32xf32> -> vector<32x32xf32>
    %c1_11 = arith.constant 1 : index
    %c0_12 = arith.constant 0 : index
    %c0_13 = arith.constant 0 : index
    %10 = vector.load %arg2[%c1_11, %c0_12, %c0_13] : memref<5x32x16xf32, #tpu.memory_space<vmem>>, vector<1x32x16xf32>
    %11 = vector.shape_cast %10 : vector<1x32x16xf32> to vector<32x16xf32>
    %cst_14 = arith.constant dense<0.000000e+00> : vector<32x16xf32>
    %12 = tpu.matmul %9, %11, %cst_14 {dimension_numbers = #tpu.dot_dimension_numbers<[1], [0], [0], [1], [0, 0, 1, 1], [], []>} : vector<32x32xf32>, vector<32x16xf32>, vector<32x16xf32> -> vector<32x16xf32>
    %13 = arith.addf %6, %12 : vector<32x16xf32>
    %c2 = arith.constant 2 : index
    %c0_15 = arith.constant 0 : index
    %c0_16 = arith.constant 0 : index
    %14 = vector.load %arg2[%c2, %c0_15, %c0_16] : memref<5x32x16xf32, #tpu.memory_space<vmem>>, vector<1x32x16xf32>
    %15 = vector.shape_cast %14 : vector<1x32x16xf32> to vector<32x16xf32>
    %cst_17 = arith.constant dense<0.000000e+00> : vector<32x16xf32>
    %16 = tpu.matmul %0, %15, %cst_17 {dimension_numbers = #tpu.dot_dimension_numbers<[1], [0], [0], [1], [0, 0, 1, 1], [], []>} : vector<32x32xf32>, vector<32x16xf32>, vector<32x16xf32> -> vector<32x16xf32>
    %17 = arith.addf %13, %16 : vector<32x16xf32>
    %c3 = arith.constant 3 : index
    %c0_18 = arith.constant 0 : index
    %c0_19 = arith.constant 0 : index
    %18 = vector.load %arg1[%c3, %c0_18, %c0_19] : memref<5x32x32xf32, #tpu.memory_space<vmem>>, vector<1x32x32xf32>
    %19 = vector.shape_cast %18 : vector<1x32x32xf32> to vector<32x32xf32>
    %cst_20 = arith.constant dense<0.000000e+00> : vector<32x32xf32>
    %20 = tpu.matmul %19, %0, %cst_20 {dimension_numbers = #tpu.dot_dimension_numbers<[1], [0], [0], [1], [0, 0, 1, 1], [], []>} : vector<32x32xf32>, vector<32x32xf32>, vector<32x32xf32> -> vector<32x32xf32>
    %c3_21 = arith.constant 3 : index
    %c0_22 = arith.constant 0 : index
    %c0_23 = arith.constant 0 : index
    %21 = vector.load %arg2[%c3_21, %c0_22, %c0_23] : memref<5x32x16xf32, #tpu.memory_space<vmem>>, vector<1x32x16xf32>
    %22 = vector.shape_cast %21 : vector<1x32x16xf32> to vector<32x16xf32>
    %cst_24 = arith.constant dense<0.000000e+00> : vector<32x16xf32>
    %23 = tpu.matmul %20, %22, %cst_24 {dimension_numbers = #tpu.dot_dimension_numbers<[1], [0], [0], [1], [0, 0, 1, 1], [], []>} : vector<32x32xf32>, vector<32x16xf32>, vector<32x16xf32> -> vector<32x16xf32>
    %24 = arith.addf %17, %23 : vector<32x16xf32>
    %c4 = arith.constant 4 : index
    %c0_25 = arith.constant 0 : index
    %c0_26 = arith.constant 0 : index
    %25 = vector.load %arg1[%c4, %c0_25, %c0_26] : memref<5x32x32xf32, #tpu.memory_space<vmem>>, vector<1x32x32xf32>
    %26 = vector.shape_cast %25 : vector<1x32x32xf32> to vector<32x32xf32>
    %cst_27 = arith.constant dense<0.000000e+00> : vector<32x32xf32>
    %27 = tpu.matmul %26, %0, %cst_27 {dimension_numbers = #tpu.dot_dimension_numbers<[1], [0], [0], [1], [0, 0, 1, 1], [], []>} : vector<32x32xf32>, vector<32x32xf32>, vector<32x32xf32> -> vector<32x32xf32>
    %c4_28 = arith.constant 4 : index
    %c0_29 = arith.constant 0 : index
    %c0_30 = arith.constant 0 : index
    %28 = vector.load %arg2[%c4_28, %c0_29, %c0_30] : memref<5x32x16xf32, #tpu.memory_space<vmem>>, vector<1x32x16xf32>
    %29 = vector.shape_cast %28 : vector<1x32x16xf32> to vector<32x16xf32>
    %cst_31 = arith.constant dense<0.000000e+00> : vector<32x16xf32>
    %30 = tpu.matmul %27, %29, %cst_31 {dimension_numbers = #tpu.dot_dimension_numbers<[1], [0], [0], [1], [0, 0, 1, 1], [], []>} : vector<32x32xf32>, vector<32x16xf32>, vector<32x16xf32> -> vector<32x16xf32>
    %31 = arith.addf %24, %30 : vector<32x16xf32>
    %cst_32 = arith.constant dense<0.000000e+00> : vector<16xf32>
    %32 = vector.multi_reduction <add>, %31, %cst_32 [0] : vector<32x16xf32> to vector<16xf32>
    %33 = vector.shape_cast %32 : vector<16xf32> to vector<1x16xf32>
    %cst_33 = arith.constant 3.200000e+01 : f32
    %34 = vector.broadcast %cst_33 : f32 to vector<1x16xf32>
    %35 = arith.divf %33, %34 : vector<1x16xf32>
    %36 = vector.broadcast %35 : vector<1x16xf32> to vector<32x16xf32>
    %37 = arith.subf %31, %36 : vector<32x16xf32>
    %38 = arith.mulf %37, %37 : vector<32x16xf32>
    %cst_34 = arith.constant dense<0.000000e+00> : vector<16xf32>
    %39 = vector.multi_reduction <add>, %38, %cst_34 [0] : vector<32x16xf32> to vector<16xf32>
    %40 = vector.shape_cast %39 : vector<16xf32> to vector<1x16xf32>
    %cst_35 = arith.constant 3.200000e+01 : f32
    %41 = vector.broadcast %cst_35 : f32 to vector<1x16xf32>
    %42 = arith.divf %40, %41 : vector<1x16xf32>
    %cst_36 = arith.constant 9.99999974E-6 : f32
    %43 = vector.broadcast %cst_36 : f32 to vector<1x16xf32>
    %44 = arith.addf %42, %43 : vector<1x16xf32>
    %45 = math.rsqrt %44 : vector<1x16xf32>
    %46 = vector.broadcast %45 : vector<1x16xf32> to vector<32x16xf32>
    %47 = arith.mulf %37, %46 : vector<32x16xf32>
    %c0_37 = arith.constant 0 : index
    %c0_38 = arith.constant 0 : index
    %48 = vector.load %arg3[%c0_37, %c0_38] : memref<1x16xf32, #tpu.memory_space<vmem>>, vector<1x16xf32>
    %49 = vector.broadcast %48 : vector<1x16xf32> to vector<32x16xf32>
    %50 = arith.mulf %47, %49 : vector<32x16xf32>
    %c0_39 = arith.constant 0 : index
    %c0_40 = arith.constant 0 : index
    %51 = vector.load %arg4[%c0_39, %c0_40] : memref<1x16xf32, #tpu.memory_space<vmem>>, vector<1x16xf32>
    %52 = vector.broadcast %51 : vector<1x16xf32> to vector<32x16xf32>
    %53 = arith.addf %50, %52 : vector<32x16xf32>
    %cst_41 = arith.constant 5.000000e-01 : f32
    %54 = vector.broadcast %cst_41 : f32 to vector<32x16xf32>
    %55 = arith.mulf %54, %53 : vector<32x16xf32>
    %cst_42 = arith.constant 0.707106769 : f32
    %56 = vector.broadcast %cst_42 : f32 to vector<32x16xf32>
    %57 = arith.mulf %53, %56 : vector<32x16xf32>
    %cst_43 = arith.constant 0.000000e+00 : f32
    %58 = vector.broadcast %cst_43 : f32 to vector<32x16xf32>
    %59 = arith.cmpf oge, %57, %58 : vector<32x16xf32>
    %cst_44 = arith.constant 1.000000e+00 : f32
    %cst_45 = arith.constant -1.000000e+00 : f32
    %60 = vector.broadcast %cst_44 : f32 to vector<32x16xf32>
    %61 = vector.broadcast %cst_45 : f32 to vector<32x16xf32>
    %62 = arith.select %59, %60, %61 : vector<32x16xi1>, vector<32x16xf32>
    %63 = math.absf %57 : vector<32x16xf32>
    %cst_46 = arith.constant 0.327591091 : f32
    %64 = vector.broadcast %cst_46 : f32 to vector<32x16xf32>
    %65 = arith.mulf %64, %63 : vector<32x16xf32>
    %cst_47 = arith.constant 1.000000e+00 : f32
    %66 = vector.broadcast %cst_47 : f32 to vector<32x16xf32>
    %67 = arith.addf %66, %65 : vector<32x16xf32>
    %cst_48 = arith.constant 1.000000e+00 : f32
    %68 = vector.broadcast %cst_48 : f32 to vector<32x16xf32>
    %69 = arith.divf %68, %67 : vector<32x16xf32>
    %cst_49 = arith.constant 1.06140542 : f32
    %70 = vector.broadcast %cst_49 : f32 to vector<32x16xf32>
    %71 = arith.mulf %70, %69 : vector<32x16xf32>
    %cst_50 = arith.constant -1.45315206 : f32
    %72 = vector.broadcast %cst_50 : f32 to vector<32x16xf32>
    %73 = arith.addf %71, %72 : vector<32x16xf32>
    %74 = arith.mulf %73, %69 : vector<32x16xf32>
    %cst_51 = arith.constant 1.42141378 : f32
    %75 = vector.broadcast %cst_51 : f32 to vector<32x16xf32>
    %76 = arith.addf %74, %75 : vector<32x16xf32>
    %77 = arith.mulf %76, %69 : vector<32x16xf32>
    %cst_52 = arith.constant -0.284496725 : f32
    %78 = vector.broadcast %cst_52 : f32 to vector<32x16xf32>
    %79 = arith.addf %77, %78 : vector<32x16xf32>
    %80 = arith.mulf %79, %69 : vector<32x16xf32>
    %cst_53 = arith.constant 0.254829586 : f32
    %81 = vector.broadcast %cst_53 : f32 to vector<32x16xf32>
    %82 = arith.addf %80, %81 : vector<32x16xf32>
    %83 = arith.mulf %82, %69 : vector<32x16xf32>
    %cst_54 = arith.constant 0.000000e+00 : f32
    %84 = vector.broadcast %cst_54 : f32 to vector<32x16xf32>
    %85 = arith.subf %84, %63 : vector<32x16xf32>
    %86 = arith.mulf %85, %63 : vector<32x16xf32>
    %87 = math.exp %86 : vector<32x16xf32>
    %88 = arith.mulf %83, %87 : vector<32x16xf32>
    %cst_55 = arith.constant 1.000000e+00 : f32
    %89 = vector.broadcast %cst_55 : f32 to vector<32x16xf32>
    %90 = arith.subf %89, %88 : vector<32x16xf32>
    %91 = arith.mulf %62, %90 : vector<32x16xf32>
    %cst_56 = arith.constant 1.000000e+00 : f32
    %92 = vector.broadcast %cst_56 : f32 to vector<32x16xf32>
    %93 = arith.addf %92, %91 : vector<32x16xf32>
    %94 = arith.mulf %55, %93 : vector<32x16xf32>
    %c0_57 = arith.constant 0 : index
    %c0_58 = arith.constant 0 : index
    %c0_59 = arith.constant 0 : index
    %95 = vector.load %arg1[%c0_57, %c0_58, %c0_59] : memref<5x32x32xf32, #tpu.memory_space<vmem>>, vector<1x32x32xf32>
    %96 = vector.shape_cast %95 : vector<1x32x32xf32> to vector<32x32xf32>
    %cst_60 = arith.constant dense<0.000000e+00> : vector<32x16xf32>
    %97 = tpu.matmul %96, %94, %cst_60 {dimension_numbers = #tpu.dot_dimension_numbers<[1], [0], [0], [1], [0, 0, 1, 1], [], []>} : vector<32x32xf32>, vector<32x16xf32>, vector<32x16xf32> -> vector<32x16xf32>
    %c0_61 = arith.constant 0 : index
    %c0_62 = arith.constant 0 : index
    %c0_63 = arith.constant 0 : index
    %98 = vector.load %arg5[%c0_61, %c0_62, %c0_63] : memref<5x16x32xf32, #tpu.memory_space<vmem>>, vector<1x16x32xf32>
    %99 = vector.shape_cast %98 : vector<1x16x32xf32> to vector<16x32xf32>
    %cst_64 = arith.constant dense<0.000000e+00> : vector<32x32xf32>
    %100 = tpu.matmul %97, %99, %cst_64 {dimension_numbers = #tpu.dot_dimension_numbers<[1], [0], [0], [1], [0, 0, 1, 1], [], []>} : vector<32x16xf32>, vector<16x32xf32>, vector<32x32xf32> -> vector<32x32xf32>
    %c1_65 = arith.constant 1 : index
    %c0_66 = arith.constant 0 : index
    %c0_67 = arith.constant 0 : index
    %101 = vector.load %arg1[%c1_65, %c0_66, %c0_67] : memref<5x32x32xf32, #tpu.memory_space<vmem>>, vector<1x32x32xf32>
    %102 = vector.shape_cast %101 : vector<1x32x32xf32> to vector<32x32xf32>
    %cst_68 = arith.constant dense<0.000000e+00> : vector<32x16xf32>
    %103 = tpu.matmul %102, %94, %cst_68 {dimension_numbers = #tpu.dot_dimension_numbers<[1], [0], [0], [1], [0, 0, 1, 1], [], []>} : vector<32x32xf32>, vector<32x16xf32>, vector<32x16xf32> -> vector<32x16xf32>
    %c1_69 = arith.constant 1 : index
    %c0_70 = arith.constant 0 : index
    %c0_71 = arith.constant 0 : index
    %104 = vector.load %arg5[%c1_69, %c0_70, %c0_71] : memref<5x16x32xf32, #tpu.memory_space<vmem>>, vector<1x16x32xf32>
    %105 = vector.shape_cast %104 : vector<1x16x32xf32> to vector<16x32xf32>
    %cst_72 = arith.constant dense<0.000000e+00> : vector<32x32xf32>
    %106 = tpu.matmul %103, %105, %cst_72 {dimension_numbers = #tpu.dot_dimension_numbers<[1], [0], [0], [1], [0, 0, 1, 1], [], []>} : vector<32x16xf32>, vector<16x32xf32>, vector<32x32xf32> -> vector<32x32xf32>
    %107 = arith.addf %100, %106 : vector<32x32xf32>
    %c2_73 = arith.constant 2 : index
    %c0_74 = arith.constant 0 : index
    %c0_75 = arith.constant 0 : index
    %108 = vector.load %arg5[%c2_73, %c0_74, %c0_75] : memref<5x16x32xf32, #tpu.memory_space<vmem>>, vector<1x16x32xf32>
    %109 = vector.shape_cast %108 : vector<1x16x32xf32> to vector<16x32xf32>
    %cst_76 = arith.constant dense<0.000000e+00> : vector<32x32xf32>
    %110 = tpu.matmul %94, %109, %cst_76 {dimension_numbers = #tpu.dot_dimension_numbers<[1], [0], [0], [1], [0, 0, 1, 1], [], []>} : vector<32x16xf32>, vector<16x32xf32>, vector<32x32xf32> -> vector<32x32xf32>
    %111 = arith.addf %107, %110 : vector<32x32xf32>
    %c3_77 = arith.constant 3 : index
    %c0_78 = arith.constant 0 : index
    %c0_79 = arith.constant 0 : index
    %112 = vector.load %arg1[%c3_77, %c0_78, %c0_79] : memref<5x32x32xf32, #tpu.memory_space<vmem>>, vector<1x32x32xf32>
    %113 = vector.shape_cast %112 : vector<1x32x32xf32> to vector<32x32xf32>
    %cst_80 = arith.constant dense<0.000000e+00> : vector<32x16xf32>
    %114 = tpu.matmul %113, %94, %cst_80 {dimension_numbers = #tpu.dot_dimension_numbers<[1], [0], [0], [1], [0, 0, 1, 1], [], []>} : vector<32x32xf32>, vector<32x16xf32>, vector<32x16xf32> -> vector<32x16xf32>
    %c3_81 = arith.constant 3 : index
    %c0_82 = arith.constant 0 : index
    %c0_83 = arith.constant 0 : index
    %115 = vector.load %arg5[%c3_81, %c0_82, %c0_83] : memref<5x16x32xf32, #tpu.memory_space<vmem>>, vector<1x16x32xf32>
    %116 = vector.shape_cast %115 : vector<1x16x32xf32> to vector<16x32xf32>
    %cst_84 = arith.constant dense<0.000000e+00> : vector<32x32xf32>
    %117 = tpu.matmul %114, %116, %cst_84 {dimension_numbers = #tpu.dot_dimension_numbers<[1], [0], [0], [1], [0, 0, 1, 1], [], []>} : vector<32x16xf32>, vector<16x32xf32>, vector<32x32xf32> -> vector<32x32xf32>
    %118 = arith.addf %111, %117 : vector<32x32xf32>
    %c4_85 = arith.constant 4 : index
    %c0_86 = arith.constant 0 : index
    %c0_87 = arith.constant 0 : index
    %119 = vector.load %arg1[%c4_85, %c0_86, %c0_87] : memref<5x32x32xf32, #tpu.memory_space<vmem>>, vector<1x32x32xf32>
    %120 = vector.shape_cast %119 : vector<1x32x32xf32> to vector<32x32xf32>
    %cst_88 = arith.constant dense<0.000000e+00> : vector<32x16xf32>
    %121 = tpu.matmul %120, %94, %cst_88 {dimension_numbers = #tpu.dot_dimension_numbers<[1], [0], [0], [1], [0, 0, 1, 1], [], []>} : vector<32x32xf32>, vector<32x16xf32>, vector<32x16xf32> -> vector<32x16xf32>
    %c4_89 = arith.constant 4 : index
    %c0_90 = arith.constant 0 : index
    %c0_91 = arith.constant 0 : index
    %122 = vector.load %arg5[%c4_89, %c0_90, %c0_91] : memref<5x16x32xf32, #tpu.memory_space<vmem>>, vector<1x16x32xf32>
    %123 = vector.shape_cast %122 : vector<1x16x32xf32> to vector<16x32xf32>
    %cst_92 = arith.constant dense<0.000000e+00> : vector<32x32xf32>
    %124 = tpu.matmul %121, %123, %cst_92 {dimension_numbers = #tpu.dot_dimension_numbers<[1], [0], [0], [1], [0, 0, 1, 1], [], []>} : vector<32x16xf32>, vector<16x32xf32>, vector<32x32xf32> -> vector<32x32xf32>
    %125 = arith.addf %118, %124 : vector<32x32xf32>
    %cst_93 = arith.constant dense<0.000000e+00> : vector<32xf32>
    %126 = vector.multi_reduction <add>, %125, %cst_93 [0] : vector<32x32xf32> to vector<32xf32>
    %127 = vector.shape_cast %126 : vector<32xf32> to vector<1x32xf32>
    %cst_94 = arith.constant 3.200000e+01 : f32
    %128 = vector.broadcast %cst_94 : f32 to vector<1x32xf32>
    %129 = arith.divf %127, %128 : vector<1x32xf32>
    %130 = vector.broadcast %129 : vector<1x32xf32> to vector<32x32xf32>
    %131 = arith.subf %125, %130 : vector<32x32xf32>
    %132 = arith.mulf %131, %131 : vector<32x32xf32>
    %cst_95 = arith.constant dense<0.000000e+00> : vector<32xf32>
    %133 = vector.multi_reduction <add>, %132, %cst_95 [0] : vector<32x32xf32> to vector<32xf32>
    %134 = vector.shape_cast %133 : vector<32xf32> to vector<1x32xf32>
    %cst_96 = arith.constant 3.200000e+01 : f32
    %135 = vector.broadcast %cst_96 : f32 to vector<1x32xf32>
    %136 = arith.divf %134, %135 : vector<1x32xf32>
    %cst_97 = arith.constant 9.99999974E-6 : f32
    %137 = vector.broadcast %cst_97 : f32 to vector<1x32xf32>
    %138 = arith.addf %136, %137 : vector<1x32xf32>
    %139 = math.rsqrt %138 : vector<1x32xf32>
    %140 = vector.broadcast %139 : vector<1x32xf32> to vector<32x32xf32>
    %141 = arith.mulf %131, %140 : vector<32x32xf32>
    %c0_98 = arith.constant 0 : index
    %c0_99 = arith.constant 0 : index
    %142 = vector.load %arg6[%c0_98, %c0_99] : memref<1x32xf32, #tpu.memory_space<vmem>>, vector<1x32xf32>
    %143 = vector.broadcast %142 : vector<1x32xf32> to vector<32x32xf32>
    %144 = arith.mulf %141, %143 : vector<32x32xf32>
    %c0_100 = arith.constant 0 : index
    %c0_101 = arith.constant 0 : index
    %145 = vector.load %arg7[%c0_100, %c0_101] : memref<1x32xf32, #tpu.memory_space<vmem>>, vector<1x32xf32>
    %146 = vector.broadcast %145 : vector<1x32xf32> to vector<32x32xf32>
    %147 = arith.addf %144, %146 : vector<32x32xf32>
    %cst_102 = arith.constant 5.000000e-01 : f32
    %148 = vector.broadcast %cst_102 : f32 to vector<32x32xf32>
    %149 = arith.mulf %148, %147 : vector<32x32xf32>
    %cst_103 = arith.constant 0.707106769 : f32
    %150 = vector.broadcast %cst_103 : f32 to vector<32x32xf32>
    %151 = arith.mulf %147, %150 : vector<32x32xf32>
    %cst_104 = arith.constant 0.000000e+00 : f32
    %152 = vector.broadcast %cst_104 : f32 to vector<32x32xf32>
    %153 = arith.cmpf oge, %151, %152 : vector<32x32xf32>
    %cst_105 = arith.constant 1.000000e+00 : f32
    %cst_106 = arith.constant -1.000000e+00 : f32
    %154 = vector.broadcast %cst_105 : f32 to vector<32x32xf32>
    %155 = vector.broadcast %cst_106 : f32 to vector<32x32xf32>
    %156 = arith.select %153, %154, %155 : vector<32x32xi1>, vector<32x32xf32>
    %157 = math.absf %151 : vector<32x32xf32>
    %cst_107 = arith.constant 0.327591091 : f32
    %158 = vector.broadcast %cst_107 : f32 to vector<32x32xf32>
    %159 = arith.mulf %158, %157 : vector<32x32xf32>
    %cst_108 = arith.constant 1.000000e+00 : f32
    %160 = vector.broadcast %cst_108 : f32 to vector<32x32xf32>
    %161 = arith.addf %160, %159 : vector<32x32xf32>
    %cst_109 = arith.constant 1.000000e+00 : f32
    %162 = vector.broadcast %cst_109 : f32 to vector<32x32xf32>
    %163 = arith.divf %162, %161 : vector<32x32xf32>
    %cst_110 = arith.constant 1.06140542 : f32
    %164 = vector.broadcast %cst_110 : f32 to vector<32x32xf32>
    %165 = arith.mulf %164, %163 : vector<32x32xf32>
    %cst_111 = arith.constant -1.45315206 : f32
    %166 = vector.broadcast %cst_111 : f32 to vector<32x32xf32>
    %167 = arith.addf %165, %166 : vector<32x32xf32>
    %168 = arith.mulf %167, %163 : vector<32x32xf32>
    %cst_112 = arith.constant 1.42141378 : f32
    %169 = vector.broadcast %cst_112 : f32 to vector<32x32xf32>
    %170 = arith.addf %168, %169 : vector<32x32xf32>
    %171 = arith.mulf %170, %163 : vector<32x32xf32>
    %cst_113 = arith.constant -0.284496725 : f32
    %172 = vector.broadcast %cst_113 : f32 to vector<32x32xf32>
    %173 = arith.addf %171, %172 : vector<32x32xf32>
    %174 = arith.mulf %173, %163 : vector<32x32xf32>
    %cst_114 = arith.constant 0.254829586 : f32
    %175 = vector.broadcast %cst_114 : f32 to vector<32x32xf32>
    %176 = arith.addf %174, %175 : vector<32x32xf32>
    %177 = arith.mulf %176, %163 : vector<32x32xf32>
    %cst_115 = arith.constant 0.000000e+00 : f32
    %178 = vector.broadcast %cst_115 : f32 to vector<32x32xf32>
    %179 = arith.subf %178, %157 : vector<32x32xf32>
    %180 = arith.mulf %179, %157 : vector<32x32xf32>
    %181 = math.exp %180 : vector<32x32xf32>
    %182 = arith.mulf %177, %181 : vector<32x32xf32>
    %cst_116 = arith.constant 1.000000e+00 : f32
    %183 = vector.broadcast %cst_116 : f32 to vector<32x32xf32>
    %184 = arith.subf %183, %182 : vector<32x32xf32>
    %185 = arith.mulf %156, %184 : vector<32x32xf32>
    %cst_117 = arith.constant 1.000000e+00 : f32
    %186 = vector.broadcast %cst_117 : f32 to vector<32x32xf32>
    %187 = arith.addf %186, %185 : vector<32x32xf32>
    %188 = arith.mulf %149, %187 : vector<32x32xf32>
    %189 = arith.addf %0, %188 : vector<32x32xf32>
    %c0_118 = arith.constant 0 : index
    %c0_119 = arith.constant 0 : index
    %190 = vector.load %arg8[%c0_118, %c0_119] : memref<32x7xf32, #tpu.memory_space<vmem>>, vector<32x7xf32>
    %cst_120 = arith.constant dense<0.000000e+00> : vector<32x7xf32>
    %191 = tpu.matmul %189, %190, %cst_120 {dimension_numbers = #tpu.dot_dimension_numbers<[1], [0], [0], [1], [0, 0, 1, 1], [], []>} : vector<32x32xf32>, vector<32x7xf32>, vector<32x7xf32> -> vector<32x7xf32>
    %c0_121 = arith.constant 0 : index
    %c0_122 = arith.constant 0 : index
    %192 = vector.load %arg9[%c0_121, %c0_122] : memref<1x7xf32, #tpu.memory_space<vmem>>, vector<1x7xf32>
    %193 = vector.broadcast %192 : vector<1x7xf32> to vector<32x7xf32>
    %194 = arith.addf %191, %193 : vector<32x7xf32>
    %195 = vector.extract_strided_slice %194 {offsets = [0, 0], sizes = [32, 3], strides = [1, 1]} : vector<32x7xf32> to vector<32x3xf32>
    %196 = vector.extract_strided_slice %194 {offsets = [0, 3], sizes = [32, 4], strides = [1, 1]} : vector<32x7xf32> to vector<32x4xf32>
    %197 = arith.mulf %196, %196 : vector<32x4xf32>
    %cst_123 = arith.constant dense<0.000000e+00> : vector<32xf32>
    %198 = vector.multi_reduction <add>, %197, %cst_123 [1] : vector<32x4xf32> to vector<32xf32>
    %199 = vector.shape_cast %198 : vector<32xf32> to vector<32x1xf32>
    %200 = math.rsqrt %199 : vector<32x1xf32>
    %201 = vector.broadcast %200 : vector<32x1xf32> to vector<32x4xf32>
    %202 = arith.mulf %196, %201 : vector<32x4xf32>
    %c0_124 = arith.constant 0 : index
    %c0_125 = arith.constant 0 : index
    %203 = vector.load %arg10[%c0_124, %c0_125] : memref<4x16xf32, #tpu.memory_space<vmem>>, vector<4x16xf32>
    %cst_126 = arith.constant dense<0.000000e+00> : vector<32x16xf32>
    %204 = tpu.matmul %202, %203, %cst_126 {dimension_numbers = #tpu.dot_dimension_numbers<[1], [0], [0], [1], [0, 0, 1, 1], [], []>} : vector<32x4xf32>, vector<4x16xf32>, vector<32x16xf32> -> vector<32x16xf32>
    %c0_127 = arith.constant 0 : index
    %c0_128 = arith.constant 0 : index
    %205 = vector.load %arg11[%c0_127, %c0_128] : memref<4x16xf32, #tpu.memory_space<vmem>>, vector<4x16xf32>
    %cst_129 = arith.constant dense<0.000000e+00> : vector<32x16xf32>
    %206 = tpu.matmul %202, %205, %cst_129 {dimension_numbers = #tpu.dot_dimension_numbers<[1], [0], [0], [1], [0, 0, 1, 1], [], []>} : vector<32x4xf32>, vector<4x16xf32>, vector<32x16xf32> -> vector<32x16xf32>
    %207 = arith.mulf %204, %206 : vector<32x16xf32>
    %c0_130 = arith.constant 0 : index
    %c0_131 = arith.constant 0 : index
    %208 = vector.load %arg12[%c0_130, %c0_131] : memref<16x12xf32, #tpu.memory_space<vmem>>, vector<16x12xf32>
    %cst_132 = arith.constant dense<0.000000e+00> : vector<32x12xf32>
    %209 = tpu.matmul %207, %208, %cst_132 {dimension_numbers = #tpu.dot_dimension_numbers<[1], [0], [0], [1], [0, 0, 1, 1], [], []>} : vector<32x16xf32>, vector<16x12xf32>, vector<32x12xf32> -> vector<32x12xf32>
    %c0_133 = arith.constant 0 : index
    %c0_134 = arith.constant 0 : index
    %210 = vector.load %arg13[%c0_133, %c0_134] : memref<3x12xf32, #tpu.memory_space<vmem>>, vector<3x12xf32>
    %cst_135 = arith.constant dense<0.000000e+00> : vector<32x12xf32>
    %211 = tpu.matmul %195, %210, %cst_135 {dimension_numbers = #tpu.dot_dimension_numbers<[1], [0], [0], [1], [0, 0, 1, 1], [], []>} : vector<32x3xf32>, vector<3x12xf32>, vector<32x12xf32> -> vector<32x12xf32>
    %212 = arith.addf %209, %211 : vector<32x12xf32>
    %c0_136 = arith.constant 0 : index
    %c0_137 = arith.constant 0 : index
    %213 = vector.load %arg14[%c0_136, %c0_137] : memref<32x12xf32, #tpu.memory_space<vmem>>, vector<32x12xf32>
    tpu.vector_store %arg14[%c0_136, %c0_137], %212 {strides = array<i32>} : memref<32x12xf32, #tpu.memory_space<vmem>>, vector<32x12xf32>,
    return
  }
}

</mosaic_0001>

<bundles_post_ra>
// kernel: tpu_custom_call.1
= control target key start
LH: loop header
LB: loop body
LE: loop exit
PB: predicated region body
PF: predicated region fallthrough
CT: control target
= control target key end

     0   :  { %19 = vsyncpa [#allocation3], 0  ;;  %s4192_s0 = inlined_call_operand.vmem [shape: f32[32,32], index: 0, kind: input, shape index: {}]   ;;  %s4193_s1 = inlined_call_operand.vmem [shape: f32[5,32,32], index: 1, kind: input, shape index: {}]   ;;  %s4194_s2 = inlined_call_operand.vmem [shape: f32[5,32,16], index: 2, kind: input, shape index: {}]   ;;  %s4195_s3 = inlined_call_operand.vmem [shape: f32[1,16], index: 3, kind: input, shape index: {}]   ;;  %s4196_s4 = inlined_call_operand.hbm [shape: f32[1,16], index: 4, kind: input, shape index: {}]   ;;  %s4197_s5 = inlined_call_operand.vmem [shape: f32[5,16,32], index: 5, kind: input, shape index: {}]   ;;  %s4198_s6 = inlined_call_operand.hbm [shape: f32[1,32], index: 6, kind: input, shape index: {}]   ;;  %s4199_s7 = inlined_call_operand.hbm [shape: f32[1,32], index: 7, kind: input, shape index: {}]   ;;  %s4200_s8 = inlined_call_operand.vmem [shape: f32[32,7], index: 8, kind: input, shape index: {}]   ;;  %s4201_s9 = inlined_call_operand.hbm [shape: f32[1,7], index: 9, kind: input, shape index: {}]   ;;  %s4202_s10 = inlined_call_operand.vmem [shape: f32[4,16], index: 10, kind: input, shape index: {}]   ;;  %s4203_s11 = inlined_call_operand.vmem [shape: f32[4,16], index: 11, kind: input, shape index: {}]   ;;  %s4204_s12 = inlined_call_operand.vmem [shape: f32[16,12], index: 12, kind: input, shape index: {}]   ;;  %s4205_s13 = inlined_call_operand.vmem [shape: f32[3,12], index: 13, kind: input, shape index: {}]   ;;  %s4206_s14 = inlined_call_operand.vmem [shape: f32[32,12], index: 14, kind: output, shape index: {}]  }
   0x1   :  { %20 = vsyncpa [#allocation5], 0 }
   0x2   :  { %21 = vsyncpa [#allocation8], 0  ;;  %s3521_s29 = smov [#allocation4]   ;;  %s3522_s15 = smov [#allocation2]  }
   0x3   :  { %s48_s30 = sshll.u32 %s3521_s29, 4  ;;  %s36_s16 = sshll.u32 %s3522_s15, 4  ;;  %s49_s30 = int_to_ptr.vmem [resolvable:$true] %s48_s30  ;;  %s37_s16 = int_to_ptr.vmem [resolvable:$true] %s36_s16 }
   0x4   :  { %s3443_s17 = scalar_lea.vmem %s49_s30, 16  ;;  %s3447_s18 = scalar_lea.vmem %s49_s30, 32 }
   0x5   :  { %p3444_p0 = scmp.ne.s32.totalorder %s49_s30, %s3443_s17  ;;  %p3448_p1 = scmp.lt.s32.totalorder %s49_s30, %s49_s30 }
   0x6   :  { %p3449_p2 = scmp.lt.s32.totalorder %s3447_s18, %s3443_s17 }
   0x8   :  { %p3450_p3 = por %p3449_p2, %p3448_p1 }
   0xa   :  { %p3451_p4 = pnand %p3450_p3, %p3444_p0 }
   0xc   :  { %3454 = shalt.err (!%p3451_p4)
}
   0xd   :  { %51 = dma.hbm_to_vmem [thread:$0]  %s4198_s6, 16, %s49_s30, [#allocation5]  }
   0xe   :  { %s3463_s21 = scalar_lea.vmem %s37_s16, 16  ;;  %s3467_s22 = scalar_lea.vmem %s37_s16, 32 }
   0xf   :  { %p3464_p5 = scmp.ne.s32.totalorder %s37_s16, %s3463_s21  ;;  %p3468_p6 = scmp.lt.s32.totalorder %s37_s16, %s37_s16 }
  0x10   :  { %p3469_p7 = scmp.lt.s32.totalorder %s3467_s22, %s3463_s21 }
  0x12   :  { %p3470_p8 = por %p3469_p7, %p3468_p6 }
  0x14   :  { %p3471_p9 = pnand %p3470_p8, %p3464_p5 }
  0x16   :  { %3474 = shalt.err (!%p3471_p9)
}
  0x17   :  { %39 = dma.hbm_to_vmem [thread:$0]  %s4196_s4, 16, %s37_s16, [#allocation3]  }
  0x18   :  { %s3523_s25 = smov [#allocation6]   ;;  %s3524_s27 = smov [#allocation7]  }
  0x19   :  { %s58_s26 = sshll.u32 %s3523_s25, 4  ;;  %s70_s28 = sshll.u32 %s3524_s27, 4  ;;  %s59_s26 = int_to_ptr.vmem [resolvable:$true] %s58_s26  ;;  %s71_s28 = int_to_ptr.vmem [resolvable:$true] %s70_s28 }
  0x1a   :  { %s3483_s29 = scalar_lea.vmem %s59_s26, 16  ;;  %s3487_s6 = scalar_lea.vmem %s59_s26, 32 }
  0x1b   :  { %p3484_p10 = scmp.ne.s32.totalorder %s59_s26, %s3483_s29  ;;  %p3488_p11 = scmp.lt.s32.totalorder %s59_s26, %s59_s26 }
  0x1c   :  { %p3489_p12 = scmp.lt.s32.totalorder %s3487_s6, %s3483_s29 }
  0x1e   :  { %p3490_p13 = por %p3489_p12, %p3488_p11 }
  0x20   :  { %p3491_p0 = pnand %p3490_p13, %p3484_p10 }
  0x22   :  { %3494 = shalt.err (!%p3491_p0)
}
  0x23   :  { %61 = dma.hbm_to_vmem [thread:$0]  %s4199_s7, 16, %s59_s26, [#allocation5]  }
  0x24   :  { %s3503_s17 = scalar_lea.vmem %s71_s28, 16  ;;  %s3507_s4 = scalar_lea.vmem %s71_s28, 32 }
  0x25   :  { %p3504_p1 = scmp.ne.s32.totalorder %s71_s28, %s3503_s17  ;;  %p3508_p2 = scmp.lt.s32.totalorder %s71_s28, %s71_s28 }
  0x26   :  { %p3509_p3 = scmp.lt.s32.totalorder %s3507_s4, %s3503_s17 }
  0x28   :  { %p3510_p4 = por %p3509_p3, %p3508_p2 }
  0x2a   :  { %p3511_p5 = pnand %p3510_p4, %p3504_p1 }
  0x2c   :  { %3514 = shalt.err (!%p3511_p5)
}
  0x2d   :  { %73 = dma.hbm_to_vmem [thread:$0]  %s4201_s9, 16, %s71_s28, [#allocation8]  }
  0x2e   :  { %3515 = dma.done.wait [#allocation3], 16  }
  0x2f   :  { %3516 = vsyncadd [#allocation3], 4294967280 }
  0x30   :  { %3517 = dma.done.wait [#allocation5], 32  }
  0x31   :  { %3518 = vsyncadd [#allocation5], 4294967264 }
  0x32   :  { %3519 = dma.done.wait [#allocation8], 16  }
  0x33   :  { %3520 = vsyncadd [#allocation8], 4294967280  ;;  %v3617_v0 = vld [vmem:[%s4192_s0 + $0x18] sm:$0xff]  ;;  %v3622_v1 = vld [vmem:[%s4192_s0 + $0x10] sm:$0xff]  ;;  %vm102_vm0 = vcmask 261120   ;;  %vm1027_vm1 = vcmask 130048  }
  0x34   :  { %3093 = vmatprep.subr.mxu0 %v3617_v0  ;;  %3107 = vmatprep.subr.mxu1 %v3617_v0  ;;  %v3631_v2 = vld [vmem:[%s4192_s0 + $0x8] sm:$0xff]  ;;  %v3640_v3 = vld [vmem:[%s4192_s0] sm:$0xff]  ;;  %v3674_v8 = vld [vmem:[%s4193_s1 + $0x10] sm:$0xff]  ;;  %s3526_s26 = smov 125   ;;  %vm2356_vm10 = vcmask 31744   ;;  %vm2398_vm11 = vcmask 1043456  }
  0x35   :  { %3094 = vmatpush3.msra.mxu0 %v3617_v0  ;;  %3108 = vmatpush3.msra.mxu1 %v3617_v0  ;;  %v3647_v4 = vld [vmem:[%s4193_s1] sm:$0xff]  ;;  %v3661_v6 = vld [vmem:[%s4193_s1 + $0x8] sm:$0xff]  ;;  %v3679_v9 = vld [vmem:[%s4193_s1 + $0x30] sm:$0xff]  ;;  %vm2596_vm12 = vcmask 1042432   ;;  %vm2583_vm13 = vcmask 23552   ;;  %vm2782_vm14 = vcmask 97280  }
  0x36   :  { %3095 = vmatprep.subr.mxu0 %v3622_v1  ;;  %3109 = vmatprep.subr.mxu1 %v3622_v1  ;;  %v3654_v5 = vld [vmem:[%s4193_s1 + $0x20] sm:$0xff]  ;;  %v3666_v7 = vld [vmem:[%s4193_s1 + $0x28] sm:$0xff]  ;;  %v2809_v10 = vld [vmem:[%s4194_s2 + $0x38] sm:$0xff] }
  0x37   :  { %3096 = vmatpush3.msra.mxu0 %v3622_v1  ;;  %3110 = vmatpush3.msra.mxu1 %v3622_v1  ;;  %v203_v11 = vld [vmem:[%s4194_s2 + $0x18] sm:$0xff]  ;;  %v2808_v14 = vld [vmem:[%s4194_s2 + $0x30] sm:$0xff]  ;;  %v2807_v16 = vld [vmem:[%s4194_s2 + $0x28] sm:$0xff] }
  0x38   :  { %3097 = vmatprep.subr.mxu0 %v3631_v2  ;;  %3111 = vmatprep.subr.mxu1 %v3631_v2  ;;  %v3701_v12 = vld [vmem:[%s4193_s1 + $0x18] sm:$0xff]  ;;  %v202_v15 = vld [vmem:[%s4194_s2 + $0x10] sm:$0xff]  ;;  %v201_v17 = vld [vmem:[%s4194_s2 + $0x8] sm:$0xff] }
  0x39   :  { %3098 = vmatpush3.msra.mxu0 %v3631_v2  ;;  %3112 = vmatpush3.msra.mxu1 %v3631_v2  ;;  %v3706_v13 = vld [vmem:[%s4193_s1 + $0x38] sm:$0xff]  ;;  %v2806_v18 = vld [vmem:[%s4194_s2 + $0x20] sm:$0xff]  ;;  %v2820_v25 = vld [vmem:[%s4194_s2 + $0x50] sm:$0xff] }
  0x3a   :  { %3099 = vmatprep.subr.mxu0 %v3640_v3  ;;  %3113 = vmatprep.subr.mxu1 %v3640_v3  ;;  %v200_v19 = vld [vmem:[%s4194_s2] sm:$0xff]  ;;  %v2821_v20 = vld [vmem:[%s4194_s2 + $0x58] sm:$0xff]  ;;  %v2819_v30 = vld [vmem:[%s4194_s2 + $0x48] sm:$0xff] }
  0x3b   :  { %3100 = vmatpush3.msra.mxu0 %v3640_v3  ;;  %3101 = vmatprep.mubr.msk.f32.mxu0 %vm102_vm0, %v3647_v4  ;;  %v2818_v31 = vld [vmem:[%s4194_s2 + $0x40] sm:$0xff]  ;;  %v3765_v33 = vld [vmem:[%s4193_s1 + $0x68] sm:$0xff]  ;;  %v3775_v34 = vld [vmem:[%s4193_s1 + $0x70] sm:$0xff] }
  0x3c   :  { %3114 = vmatpush3.msra.mxu1 %v3640_v3  ;;  %3115 = vmatprep.mubr.msk.f32.mxu1 %vm102_vm0, %v3654_v5  ;;  %v3759_v32 = vld [vmem:[%s4193_s1 + $0x60] sm:$0xff]  ;;  %v3790_v35 = vld [vmem:[%s4193_s1 + $0x78] sm:$0xff]  ;;  %v3810_v37 = vld [vmem:[%s4193_s1 + $0x88] sm:$0xff] }
  0x3d   :  { %3102 = vmatmul.mubr.msk.f32.vlgmr.msra.gmra.mxu0 %vm102_vm0, %v3661_v6  ;;  %3116 = vmatmul.mubr.msk.f32.vlgmr.msra.gmra.mxu1 %vm102_vm0, %v3666_v7  ;;  %v3796_v36 = vld [vmem:[%s4193_s1 + $0x80] sm:$0xff]  ;;  %v3816_v38 = vld [vmem:[%s4193_s1 + $0x90] sm:$0xff]  ;;  %v3826_v39 = vld [vmem:[%s4193_s1 + $0x98] sm:$0xff] }
  0x3e   :  { %3104 = vmatprep.mubr.msk.f32.mxu0 %vm102_vm0, %v3674_v8  ;;  %3118 = vmatprep.mubr.msk.f32.mxu1 %vm102_vm0, %v3679_v9  ;;  %v2837_v40 = vld [vmem:[%s4194_s2 + $0x78] sm:$0xff]  ;;  %v2836_v41 = vld [vmem:[%s4194_s2 + $0x70] sm:$0xff]  ;;  %v2835_v42 = vld [vmem:[%s4194_s2 + $0x68] sm:$0xff] }
  0x3f   :  { %3121 = vmatprep.subr.mxu0 %v2809_v10  ;;  %3135 = vmatprep.subr.mxu1 %v203_v11  ;;  %v2834_v43 = vld [vmem:[%s4194_s2 + $0x60] sm:$0xff]  ;;  %v2853_v44 = vld [vmem:[%s4194_s2 + $0x98] sm:$0xff]  ;;  %v2852_v51 = vld [vmem:[%s4194_s2 + $0x90] sm:$0xff] }
  0x40   :  { %3122 = vmatpush3.msra.mxu0 %v2809_v10  ;;  %3136 = vmatpush3.msra.mxu1 %v203_v11  ;;  %v2851_v53 = vld [vmem:[%s4194_s2 + $0x88] sm:$0xff]  ;;  %v2850_v55 = vld [vmem:[%s4194_s2 + $0x80] sm:$0xff] }
  0x41   :  { %3105 = vmatmul.mubr.msk.f32.gmra.mxu0 %vm102_vm0, %v3701_v12  ;;  %3119 = vmatmul.mubr.msk.f32.gmra.mxu1 %vm102_vm0, %v3706_v13 }
  0x42   :  { %3123 = vmatprep.subr.mxu0 %v2808_v14  ;;  %3137 = vmatprep.subr.mxu1 %v202_v15 }
  0x43   :  { %3124 = vmatpush3.msra.mxu0 %v2808_v14  ;;  %3138 = vmatpush3.msra.mxu1 %v202_v15 }
  0x44   :  { %3125 = vmatprep.subr.mxu0 %v2807_v16  ;;  %3139 = vmatprep.subr.mxu1 %v201_v17 }
  0x45   :  { %3126 = vmatpush3.msra.mxu0 %v2807_v16  ;;  %3140 = vmatpush3.msra.mxu1 %v201_v17 }
  0x46   :  { %3127 = vmatprep.subr.mxu0 %v2806_v18  ;;  %3141 = vmatprep.subr.mxu1 %v200_v19 }
  0x47   :  { %3128 = vmatpush3.msra.mxu0 %v2806_v18  ;;  %3142 = vmatpush3.msra.mxu1 %v200_v19 }
  0x48   :  { %3149 = vmatprep.subr.mxu0 %v2821_v20  ;;  %3163 = vmatprep.subr.mxu1 %v3617_v0 }
  0xfd   :  { %v3103_v21 = vpop.f32.mrf.mxu0  ;;  %v3117_v22 = vpop.f32.mrf.mxu1 }
  0xff   :  { %v181_v23 = vpop.f32.mrf.mxu0  ;;  %v287_v24 = vpop.f32.mrf.mxu1 }
 0x100   :  { %3129 = vmatprep.mubr.msk.f32.mxu0 %vm102_vm0, %v287_v24  ;;  %3143 = vmatprep.mubr.msk.f32.mxu1 %vm102_vm0, %v181_v23 }
 0x101   :  { %v3106_v26 = vpop.f32.mrf.mxu0  ;;  %v3120_v27 = vpop.f32.mrf.mxu1  ;;  %3130 = vmatmul.mubr.msk.f32.vlgmr.msra.gmra.mxu0 %vm102_vm0, %v3117_v22  ;;  %3144 = vmatmul.mubr.msk.f32.vlgmr.msra.gmra.mxu1 %vm102_vm0, %v3103_v21 }
 0x102   :  { %3150 = vmatpush3.msra.mxu0 %v2821_v20  ;;  %3164 = vmatpush3.msra.mxu1 %v3617_v0 }
 0x103   :  { %v191_v28 = vpop.f32.mrf.mxu0  ;;  %v297_v29 = vpop.f32.mrf.mxu1  ;;  %3151 = vmatprep.subr.mxu0 %v2820_v25  ;;  %3165 = vmatprep.subr.mxu1 %v3622_v1 }
 0x104   :  { %3132 = vmatprep.mubr.msk.f32.mxu0 %vm102_vm0, %v297_v29  ;;  %3146 = vmatprep.mubr.msk.f32.mxu1 %vm102_vm0, %v191_v28 }
 0x105   :  { %3152 = vmatpush3.msra.mxu0 %v2820_v25  ;;  %3166 = vmatpush3.msra.mxu1 %v3622_v1 }
 0x106   :  { %3133 = vmatmul.mubr.msk.f32.gmra.mxu0 %vm102_vm0, %v3120_v27  ;;  %3147 = vmatmul.mubr.msk.f32.gmra.mxu1 %vm102_vm0, %v3106_v26 }
 0x107   :  { %3153 = vmatprep.subr.mxu0 %v2819_v30  ;;  %3167 = vmatprep.subr.mxu1 %v3631_v2 }
 0x108   :  { %3154 = vmatpush3.msra.mxu0 %v2819_v30  ;;  %3168 = vmatpush3.msra.mxu1 %v3631_v2 }
 0x109   :  { %3155 = vmatprep.subr.mxu0 %v2818_v31  ;;  %3169 = vmatprep.subr.mxu1 %v3640_v3 }
 0x10a   :  { %3156 = vmatpush3.msra.mxu0 %v2818_v31  ;;  %3157 = vmatprep.mubr.msk.f32.mxu0 %vm102_vm0, %v3640_v3 }
 0x10b   :  { %3170 = vmatpush3.msra.mxu1 %v3640_v3  ;;  %3171 = vmatprep.mubr.msk.f32.mxu1 %vm102_vm0, %v3759_v32 }
 0x10c   :  { %3158 = vmatmul.mubr.msk.f32.vlgmr.msra.gmra.mxu0 %vm102_vm0, %v3631_v2  ;;  %3172 = vmatmul.mubr.msk.f32.vlgmr.msra.gmra.mxu1 %vm102_vm0, %v3765_v33 }
 0x10d   :  { %3191 = vmatprep.subr.mxu1 %v3617_v0  ;;  %3160 = vmatprep.mubr.msk.f32.mxu0 %vm102_vm0, %v3622_v1 }
 0x10e   :  { %3192 = vmatpush3.msra.mxu1 %v3617_v0  ;;  %3174 = vmatprep.mubr.msk.f32.mxu1 %vm102_vm0, %v3775_v34 }
 0x10f   :  { %3193 = vmatprep.subr.mxu1 %v3622_v1  ;;  %3177 = vmatprep.subr.mxu0 %v2837_v40 }
 0x110   :  { %3194 = vmatpush3.msra.mxu1 %v3622_v1  ;;  %3161 = vmatmul.mubr.msk.f32.gmra.mxu0 %vm102_vm0, %v3617_v0 }
 0x111   :  { %3175 = vmatmul.mubr.msk.f32.gmra.mxu1 %vm102_vm0, %v3790_v35  ;;  %3195 = vmatprep.subr.mxu1 %v3631_v2 }
 0x112   :  { %3196 = vmatpush3.msra.mxu1 %v3631_v2  ;;  %3199 = vmatprep.mubr.msk.f32.mxu1 %vm102_vm0, %v3796_v36 }
 0x113   :  { %3197 = vmatprep.subr.mxu1 %v3640_v3  ;;  %3178 = vmatpush3.msra.mxu0 %v2837_v40 }
 0x114   :  { %3198 = vmatpush3.msra.mxu1 %v3640_v3  ;;  %3179 = vmatprep.subr.mxu0 %v2836_v41 }
 0x115   :  { %3200 = vmatmul.mubr.msk.f32.vlgmr.msra.gmra.mxu1 %vm102_vm0, %v3810_v37  ;;  %3180 = vmatpush3.msra.mxu0 %v2836_v41 }
 0x116   :  { %3202 = vmatprep.mubr.msk.f32.mxu1 %vm102_vm0, %v3816_v38  ;;  %3181 = vmatprep.subr.mxu0 %v2835_v42 }
 0x117   :  { %3182 = vmatpush3.msra.mxu0 %v2835_v42 }
 0x118   :  { %3183 = vmatprep.subr.mxu0 %v2834_v43 }
 0x119   :  { %3203 = vmatmul.mubr.msk.f32.gmra.mxu1 %vm102_vm0, %v3826_v39  ;;  %3184 = vmatpush3.msra.mxu0 %v2834_v43 }
 0x11a   :  { %3227 = vmatprep.mubr.msk.f32.mxu1 %vm102_vm0, %v3647_v4  ;;  %3205 = vmatprep.subr.mxu0 %v2853_v44 }
 0x1c1   :  { %v3145_v45 = vpop.f32.mrf.mxu1  ;;  %v3131_v60 = vpop.f32.mrf.mxu0 }
 0x1c2   :  { %v492_v11 = vadd.f32 %v3145_v45, %v3131_v60 }
 0x1c3   :  { %v486_v46 = vpop.f32.mrf.mxu1  ;;  %v389_v61 = vpop.f32.mrf.mxu0 }
 0x1c4   :  { %v487_v15 = vadd.f32 %v486_v46, %v389_v61 }
 0x1c6   :  { %v3148_v47 = vpop.f32.mrf.mxu1  ;;  %v3134_v62 = vpop.f32.mrf.mxu0 }
 0x1c7   :  { %v502_v21 = vadd.f32 %v3148_v47, %v3134_v62 }
 0x1c8   :  { %v496_v48 = vpop.f32.mrf.mxu1  ;;  %v399_v63 = vpop.f32.mrf.mxu0 }
 0x1cc   :  { %v3173_v49 = vpop.f32.mrf.mxu1  ;;  %v3159_v0 = vpop.f32.mrf.mxu0 }
 0x1cd   :  { %v608_v16 = vadd.f32 %v3159_v0, %v492_v11 }
 0x1ce   :  { %v694_v50 = vpop.f32.mrf.mxu1  ;;  %v588_v1 = vpop.f32.mrf.mxu0 }
 0x1cf   :  { %3185 = vmatprep.mubr.msk.f32.mxu0 %vm102_vm0, %v694_v50  ;;  %v607_v18 = vadd.f32 %v588_v1, %v487_v15 }
 0x1d0   :  { %3186 = vmatmul.mubr.msk.f32.vlgmr.msra.gmra.mxu0 %vm102_vm0, %v3173_v49  ;;  %v3162_v2 = vpop.f32.mrf.mxu0 }
 0x1d1   :  { %v3176_v52 = vpop.f32.mrf.mxu1  ;;  %3206 = vmatpush3.msra.mxu0 %v2853_v44  ;;  %v610_v25 = vadd.f32 %v3162_v2, %v502_v21 }
 0x1d2   :  { %3207 = vmatprep.subr.mxu0 %v2852_v51  ;;  %v598_v3 = vpop.f32.mrf.mxu0 }
 0x1d3   :  { %v704_v54 = vpop.f32.mrf.mxu1  ;;  %3208 = vmatpush3.msra.mxu0 %v2852_v51 }
 0x1d4   :  { %3188 = vmatprep.mubr.msk.f32.mxu0 %vm102_vm0, %v704_v54  ;;  %3209 = vmatprep.subr.mxu0 %v2851_v53 }
 0x1d5   :  { %3189 = vmatmul.mubr.msk.f32.gmra.mxu0 %vm102_vm0, %v3176_v52  ;;  %v3201_v56 = vpop.f32.mrf.mxu1 }
 0x1d6   :  { %3210 = vmatpush3.msra.mxu0 %v2851_v53 }
 0x1d7   :  { %v902_v57 = vpop.f32.mrf.mxu1  ;;  %3211 = vmatprep.subr.mxu0 %v2850_v55 }
 0x1d8   :  { %3212 = vmatpush3.msra.mxu0 %v2850_v55  ;;  %3213 = vmatprep.mubr.msk.f32.mxu0 %vm102_vm0, %v902_v57 }
 0x1d9   :  { %v3204_v58 = vpop.f32.mrf.mxu1  ;;  %3214 = vmatmul.mubr.msk.f32.vlgmr.msra.gmra.mxu0 %vm102_vm0, %v3201_v56 }
 0x1db   :  { %v912_v59 = vpop.f32.mrf.mxu1 }
 0x1dc   :  { %3216 = vmatprep.mubr.msk.f32.mxu0 %vm102_vm0, %v912_v59 }
 0x1dd   :  { %3217 = vmatmul.mubr.msk.f32.gmra.mxu0 %vm102_vm0, %v3204_v58 }
 0x1de   :  { %3241 = vmatprep.mubr.msk.f32.mxu0 %vm102_vm0, %v3654_v5  ;;  %v497_v5 = vadd.f32 %v496_v48, %v399_v63 }
 0x1e0   :  { %v609_v26 = vadd.f32 %v598_v3, %v497_v5 }
 0x290   :  { %v3187_v4 = vpop.f32.mrf.mxu0 }
 0x291   :  { %v816_v19 = vadd.f32 %v3187_v4, %v608_v16 }
 0x292   :  { %v796_v10 = vpop.f32.mrf.mxu0 }
 0x293   :  { %v815_v22 = vadd.f32 %v796_v10, %v607_v18 }
 0x295   :  { %v3190_v14 = vpop.f32.mrf.mxu0 }
 0x296   :  { %v818_v29 = vadd.f32 %v3190_v14, %v610_v25 }
 0x297   :  { %v806_v17 = vpop.f32.mrf.mxu0 }
 0x298   :  { %v817_v30 = vadd.f32 %v806_v17, %v609_v26 }
 0x299   :  { %v3215_v20 = vpop.f32.mrf.mxu0 }
 0x29a   :  { %v1024_v23 = vadd.f32 %v3215_v20, %v816_v19 }
 0x29b   :  { %v1004_v24 = vpop.f32.mrf.mxu0 }
 0x29c   :  { %v1023_v27 = vadd.f32 %v1004_v24, %v815_v22  ;;  %v1029_v31 = vsel %vm1027_vm1, %v1024_v23, 0.0  ;;  %v2858_v22 = vld [vmem:[%s4195_s3] ss:$0 sm:$0xff] }
 0x29d   :  { %v3218_v28 = vpop.f32.mrf.mxu0 }
 0x29e   :  { %v1028_v40 = vsel %vm1027_vm1, %v1023_v27, 0.0  ;;  %v1026_v43 = vadd.f32 %v3218_v28, %v818_v29 }
 0x29f   :  { %v1030_v41 = vadd.f32 %v1029_v31, %v1028_v40  ;;  %v1014_v42 = vpop.f32.mrf.mxu0 }
 0x2a0   :  { %v1025_v44 = vadd.f32 %v1014_v42, %v817_v30  ;;  %v1033_v47 = vsel %vm1027_vm1, %v1026_v43, 0.0 }
 0x2a2   :  { %v1031_v45 = vsel %vm1027_vm1, %v1025_v44, 0.0 }
 0x2a3   :  { %v1032_v46 = vadd.f32 %v1031_v45, %v1030_v41 }
 0x2a5   :  { %v1034_v48 = vadd.f32 %v1033_v47, %v1032_v46 }
 0x2a7   :  { %v1035_v49 = vrot.slane %v1034_v48, 4 }
 0x2a9   :  { %v1036_v50 = vadd.f32 %v1035_v49, %v1034_v48 }
 0x2ab   :  { %v1037_v51 = vrot.slane %v1036_v50, 2 }
 0x2ad   :  { %v1038_v52 = vadd.f32 %v1037_v51, %v1036_v50 }
 0x2af   :  { %v1039_v53 = vrot.slane %v1038_v52, 1 }
 0x2b1   :  { %v1040_v54 = vadd.f32 %v1039_v53, %v1038_v52 }
 0x2b3   :  { %v1042_v55 = vmul.f32 0.03125, %v1040_v54 }
 0x2b5   :  { %v1043_v56 = vsub.f32 %v1023_v27, %v1042_v55  ;;  %v1044_v57 = vsub.f32 %v1024_v23, %v1042_v55  ;;  %v1045_v58 = vsub.f32 %v1025_v44, %v1042_v55  ;;  %v1046_v59 = vsub.f32 %v1026_v43, %v1042_v55  ;;  %v2859_v27 = vld [vmem:[#allocation2] ss:$0 sm:$0xff] }
 0x2b7   :  { %v1047_v60 = vmul.f32 %v1043_v56, %v1043_v56  ;;  %v1048_v61 = vmul.f32 %v1044_v57, %v1044_v57  ;;  %v1049_v62 = vmul.f32 %v1045_v58, %v1045_v58  ;;  %v1050_v63 = vmul.f32 %v1046_v59, %v1046_v59 }
 0x2b9   :  { %v1051_v0 = vsel %vm1027_vm1, %v1047_v60, 0.0  ;;  %v1052_v1 = vsel %vm1027_vm1, %v1048_v61, 0.0  ;;  %v1054_v3 = vsel %vm1027_vm1, %v1049_v62, 0.0  ;;  %v1056_v10 = vsel %vm1027_vm1, %v1050_v63, 0.0 }
 0x2ba   :  { %v1053_v2 = vadd.f32 %v1052_v1, %v1051_v0 }
 0x2bc   :  { %v1055_v4 = vadd.f32 %v1054_v3, %v1053_v2 }
 0x2be   :  { %v1057_v11 = vadd.f32 %v1056_v10, %v1055_v4 }
 0x2c0   :  { %v1058_v14 = vrot.slane %v1057_v11, 4 }
 0x2c2   :  { %v1059_v15 = vadd.f32 %v1058_v14, %v1057_v11 }
 0x2c4   :  { %v1060_v16 = vrot.slane %v1059_v15, 2 }
 0x2c6   :  { %v1061_v17 = vadd.f32 %v1060_v16, %v1059_v15 }
 0x2c8   :  { %v1062_v18 = vrot.slane %v1061_v17, 1 }
 0x2ca   :  { %v1063_v19 = vadd.f32 %v1062_v18, %v1061_v17 }
 0x2cc   :  { %v1064_v20 = vmul.f32 0.03125, %v1063_v19 }
 0x2ce   :  { %v1065_v21 = vadd.f32 1e-05, %v1064_v20 }
 0x2d0   :  { %3387 = vrsqrt.f32 %v1065_v21 }
 0x2dd   :  { %v3388_v5 = vpop.eup %3387 }
 0x2de   :  { %v1067_v23 = vmul.f32 %v3388_v5, %v1043_v56  ;;  %v1068_v24 = vmul.f32 %v3388_v5, %v1044_v57  ;;  %v1069_v25 = vmul.f32 %v3388_v5, %v1045_v58  ;;  %v1070_v26 = vmul.f32 %v3388_v5, %v1046_v59 }
 0x2e0   :  { %v1078_v28 = vmul.f32 %v2858_v22, %v1067_v23  ;;  %v1079_v29 = vmul.f32 %v2858_v22, %v1068_v24  ;;  %v1080_v30 = vmul.f32 %v2858_v22, %v1069_v25  ;;  %v1081_v31 = vmul.f32 %v2858_v22, %v1070_v26 }
 0x2e2   :  { %v3877_v40 = vadd.f32 %v2859_v27, %v1078_v28  ;;  %v3879_v41 = vadd.f32 %v2859_v27, %v1079_v29  ;;  %v3881_v42 = vadd.f32 %v2859_v27, %v1080_v30  ;;  %v3883_v43 = vadd.f32 %v2859_v27, %v1081_v31 }
 0x2e4   :  { %v3886_v44 = vmul.f32 0.70710677, %v3877_v40  ;;  %v3889_v45 = vmul.f32 0.70710677, %v3879_v41  ;;  %v3892_v46 = vmul.f32 0.70710677, %v3881_v42 }
 0x2e5   :  { %v3895_v47 = vmul.f32 0.70710677, %v3883_v43 }
 0x2e6   :  { %v1109_v48 = vand.u32 2147483647, %v3886_v44  ;;  %v1110_v49 = vand.u32 2147483647, %v3889_v45  ;;  %v1111_v50 = vand.u32 2147483647, %v3892_v46 }
 0x2e7   :  { %v1112_v51 = vand.u32 2147483647, %v3895_v47  ;;  %vm1103_vm2 = vcmp.ge.f32.partialorder %v3892_v46, 0.0  ;;  %vm1102_vm3 = vcmp.ge.f32.partialorder %v3889_v45, 0.0  ;;  %vm1104_vm4 = vcmp.ge.f32.partialorder %v3895_v47, 0.0 }
 0x2e8   :  { %v1113_v52 = vmul.f32 0.3275911, %v1109_v48  ;;  %v1114_v53 = vmul.f32 0.3275911, %v1110_v49  ;;  %v1115_v54 = vmul.f32 0.3275911, %v1111_v50 }
 0x2e9   :  { %v1116_v55 = vmul.f32 0.3275911, %v1112_v51  ;;  %v1165_v60 = vsub.f32 0.0, %v1109_v48  ;;  %v1166_v61 = vsub.f32 0.0, %v1110_v49  ;;  %v1167_v62 = vsub.f32 0.0, %v1111_v50 }
 0x2ea   :  { %v1117_v56 = vadd.f32 1.0, %v1113_v52  ;;  %v1118_v57 = vadd.f32 1.0, %v1114_v53  ;;  %v1119_v58 = vadd.f32 1.0, %v1115_v54  ;;  %v1168_v63 = vsub.f32 0.0, %v1112_v51 }
 0x2eb   :  { %v1120_v59 = vadd.f32 1.0, %v1116_v55  ;;  %v1169_v0 = vmul.f32 %v1165_v60, %v1109_v48  ;;  %v1170_v1 = vmul.f32 %v1166_v61, %v1110_v49  ;;  %v1171_v2 = vmul.f32 %v1167_v62, %v1111_v50 }
 0x2ec   :  { %3389 = vrcp.f32 %v1117_v56  ;;  %v1172_v4 = vmul.f32 %v1168_v63, %v1112_v51  ;;  %vm1101_vm5 = vcmp.ge.f32.partialorder %v3886_v44, 0.0  ;;  %v1096_v47 = vmul.f32 0.5, %v3883_v43 }
 0x2ed   :  { %3391 = vrcp.f32 %v1118_v57  ;;  %v1173_v14 = vmul.f32 1.442695, %v1169_v0  ;;  %v1175_v17 = vmul.f32 1.442695, %v1170_v1  ;;  %v1177_v21 = vmul.f32 1.442695, %v1171_v2 }
 0x2ee   :  { %3393 = vrcp.f32 %v1119_v58  ;;  %v1179_v23 = vmul.f32 1.442695, %v1172_v4  ;;  %v1095_v44 = vmul.f32 0.5, %v3881_v42  ;;  %v1093_v43 = vmul.f32 0.5, %v3877_v40  ;;  %v1287_v40 = vld [vmem:[%s4197_s5 + $0x8] sm:$0xff]  ;;  %v1286_v42 = vld [vmem:[%s4197_s5] sm:$0xff] }
 0x2ef   :  { %3395 = vrcp.f32 %v1120_v59 }
 0x2f0   :  { %3397 = vpow2.f32 %v1173_v14 }
 0x2f1   :  { %3399 = vpow2.f32 %v1175_v17 }
 0x2f2   :  { %3401 = vpow2.f32 %v1177_v21 }
 0x2f3   :  { %3403 = vpow2.f32 %v1179_v23 }
 0x2f9   :  { %v3390_v3 = vpop.eup %3389 }
 0x2fa   :  { %v3392_v10 = vpop.eup %3391  ;;  %v1129_v11 = vmul.f32 1.0614054, %v3390_v3 }
 0x2fb   :  { %v3394_v15 = vpop.eup %3393  ;;  %v1130_v16 = vmul.f32 1.0614054, %v3392_v10 }
 0x2fc   :  { %v3396_v18 = vpop.eup %3395  ;;  %v1131_v19 = vmul.f32 1.0614054, %v3394_v15  ;;  %v1133_v20 = vadd.f32 -1.4531521, %v1129_v11 }
 0x2fd   :  { %v1132_v5 = vmul.f32 1.0614054, %v3396_v18  ;;  %v1134_v22 = vadd.f32 -1.4531521, %v1130_v16  ;;  %v3398_v2 = vpop.eup %3397 }
 0x2fe   :  { %v1135_v24 = vadd.f32 -1.4531521, %v1131_v19  ;;  %v1137_v25 = vmul.f32 %v3390_v3, %v1133_v20  ;;  %v3400_v14 = vpop.eup %3399 }
 0x2ff   :  { %v1136_v26 = vadd.f32 -1.4531521, %v1132_v5  ;;  %v1138_v27 = vmul.f32 %v3392_v10, %v1134_v22  ;;  %v3402_v17 = vpop.eup %3401 }
 0x300   :  { %v1139_v28 = vmul.f32 %v3394_v15, %v1135_v24  ;;  %v1141_v29 = vadd.f32 1.4214138, %v1137_v25  ;;  %v3404_v5 = vpop.eup %3403 }
 0x301   :  { %v1140_v30 = vmul.f32 %v3396_v18, %v1136_v26  ;;  %v1142_v31 = vadd.f32 1.4214138, %v1138_v27 }
 0x302   :  { %v1143_v48 = vadd.f32 1.4214138, %v1139_v28  ;;  %v1145_v49 = vmul.f32 %v3390_v3, %v1141_v29 }
 0x303   :  { %v1144_v50 = vadd.f32 1.4214138, %v1140_v30  ;;  %v1146_v51 = vmul.f32 %v3392_v10, %v1142_v31 }
 0x304   :  { %v1147_v52 = vmul.f32 %v3394_v15, %v1143_v48  ;;  %v1149_v53 = vadd.f32 -0.28449672, %v1145_v49 }
 0x305   :  { %v1148_v54 = vmul.f32 %v3396_v18, %v1144_v50  ;;  %v1150_v55 = vadd.f32 -0.28449672, %v1146_v51  ;;  %v1094_v51 = vmul.f32 0.5, %v3879_v41 }
 0x306   :  { %v1151_v56 = vadd.f32 -0.28449672, %v1147_v52  ;;  %v1153_v57 = vmul.f32 %v3390_v3, %v1149_v53 }
 0x307   :  { %v1152_v58 = vadd.f32 -0.28449672, %v1148_v54  ;;  %v1154_v59 = vmul.f32 %v3392_v10, %v1150_v55 }
 0x308   :  { %v1155_v60 = vmul.f32 %v3394_v15, %v1151_v56  ;;  %v1157_v61 = vadd.f32 0.2548296, %v1153_v57  ;;  %v2878_v56 = vld [vmem:[%s4197_s5 + $0x20] sm:$0xff] }
 0x309   :  { %v1156_v62 = vmul.f32 %v3396_v18, %v1152_v58  ;;  %v1158_v63 = vadd.f32 0.2548296, %v1154_v59 }
 0x30a   :  { %v1159_v0 = vadd.f32 0.2548296, %v1155_v60  ;;  %v1161_v1 = vmul.f32 %v3390_v3, %v1157_v61 }
 0x30b   :  { %v1160_v4 = vadd.f32 0.2548296, %v1156_v62  ;;  %v1162_v11 = vmul.f32 %v3392_v10, %v1158_v63  ;;  %v3525_v10 = vmov -1.0   ;;  %v2898_v62 = vld [vmem:[%s4197_s5 + $0x40] sm:$0xff] }
 0x30c   :  { %v1163_v16 = vmul.f32 %v3394_v15, %v1159_v0  ;;  %v1181_v20 = vmul.f32 %v3398_v2, %v1161_v1  ;;  %v1107_v15 = vsel %vm1103_vm2, 1.0, %v3525_v10  ;;  %v1106_v26 = vsel %vm1102_vm3, 1.0, %v3525_v10 }
 0x30d   :  { %v1164_v19 = vmul.f32 %v3396_v18, %v1160_v4  ;;  %v1182_v21 = vmul.f32 %v3400_v14, %v1162_v11  ;;  %v1108_v27 = vsel %vm1104_vm4, 1.0, %v3525_v10  ;;  %v1105_v45 = vsel %vm1101_vm5, 1.0, %v3525_v10  ;;  %v2231_v14 = vld [vmem:[%s4200_s8 + $0x18] sm:$0xff] }
 0x30e   :  { %v1183_v22 = vmul.f32 %v3402_v17, %v1163_v16  ;;  %v1185_v25 = vsub.f32 1.0, %v1181_v20  ;;  %v2230_v16 = vld [vmem:[%s4200_s8 + $0x10] sm:$0xff]  ;;  %v2229_v17 = vld [vmem:[%s4200_s8 + $0x8] sm:$0xff] }
 0x30f   :  { %v1184_v23 = vmul.f32 %v3404_v5, %v1164_v19  ;;  %v1186_v24 = vsub.f32 1.0, %v1182_v21  ;;  %v2228_v19 = vld [vmem:[%s4200_s8] sm:$0xff] }
 0x310   :  { %v1187_v3 = vsub.f32 1.0, %v1183_v22  ;;  %v1189_v30 = vmul.f32 %v1185_v25, %v1105_v45 }
 0x311   :  { %v1188_v18 = vsub.f32 1.0, %v1184_v23  ;;  %v1190_v28 = vmul.f32 %v1186_v24, %v1106_v26 }
 0x312   :  { %v1191_v46 = vmul.f32 %v1187_v3, %v1107_v15  ;;  %v1193_v52 = vadd.f32 1.0, %v1189_v30 }
 0x313   :  { %v1192_v29 = vmul.f32 %v1188_v18, %v1108_v27  ;;  %v1194_v49 = vadd.f32 1.0, %v1190_v28 }
 0x314   :  { %v1195_v31 = vadd.f32 1.0, %v1191_v46  ;;  %v3927_v41 = vmul.f32 %v1193_v52, %v1093_v43 }
 0x315   :  { %v1196_v48 = vadd.f32 1.0, %v1192_v29  ;;  %v3921_v54 = vmul.f32 %v1194_v49, %v1094_v51 }
 0x316   :  { %v3914_v53 = vmul.f32 %v1195_v31, %v1095_v44 }
 0x317   :  { %v3911_v50 = vmul.f32 %v1196_v48, %v1096_v47 }
 0x319   :  { %3219 = vmatprep.subr.mxu1 %v3911_v50  ;;  %3233 = vmatprep.subr.mxu0 %v3911_v50 }
 0x31a   :  { %3220 = vmatpush3.msra.mxu1 %v3911_v50  ;;  %3234 = vmatpush3.msra.mxu0 %v3911_v50 }
 0x31b   :  { %3221 = vmatprep.subr.mxu1 %v3914_v53  ;;  %3235 = vmatprep.subr.mxu0 %v3914_v53 }
 0x31c   :  { %3222 = vmatpush3.msra.mxu1 %v3914_v53  ;;  %3236 = vmatpush3.msra.mxu0 %v3914_v53 }
 0x31d   :  { %3223 = vmatprep.subr.mxu1 %v3921_v54  ;;  %3237 = vmatprep.subr.mxu0 %v3921_v54 }
 0x31e   :  { %3224 = vmatpush3.msra.mxu1 %v3921_v54  ;;  %3238 = vmatpush3.msra.mxu0 %v3921_v54 }
 0x31f   :  { %3225 = vmatprep.subr.mxu1 %v3927_v41  ;;  %3239 = vmatprep.subr.mxu0 %v3927_v41 }
 0x320   :  { %3226 = vmatpush3.msra.mxu1 %v3927_v41  ;;  %3240 = vmatpush3.msra.mxu0 %v3927_v41 }
 0x321   :  { %3228 = vmatmul.mubr.msk.f32.vlgmr.msra.gmra.mxu1 %vm102_vm0, %v3661_v6  ;;  %3373 = vmatprep.subr.mxu1 %v3911_v50  ;;  %v2869_v6 = vld [vmem:[%s4197_s5 + $0x18] sm:$0xff] }
 0x322   :  { %3242 = vmatmul.mubr.msk.f32.vlgmr.msra.gmra.mxu0 %vm102_vm0, %v3666_v7  ;;  %3257 = vmatprep.subr.mxu0 %v1287_v40  ;;  %v2868_v7 = vld [vmem:[%s4197_s5 + $0x10] sm:$0xff] }
 0x323   :  { %3377 = vmatpush3.msra.mxu1 %v3911_v50  ;;  %3258 = vmatpush3.msra.mxu0 %v1287_v40 }
 0x324   :  { %3374 = vmatprep.subr.mxu1 %v3914_v53  ;;  %3259 = vmatprep.subr.mxu0 %v1286_v42 }
 0x325   :  { %3230 = vmatprep.mubr.msk.f32.mxu1 %vm102_vm0, %v3674_v8  ;;  %3378 = vmatpush3.msra.mxu1 %v3914_v53  ;;  %v2879_v8 = vld [vmem:[%s4197_s5 + $0x28] sm:$0xff] }
 0x326   :  { %3260 = vmatpush3.msra.mxu0 %v1286_v42  ;;  %3231 = vmatmul.mubr.msk.f32.gmra.mxu1 %vm102_vm0, %v3701_v12 }
 0x327   :  { %3375 = vmatprep.subr.mxu1 %v3921_v54  ;;  %3277 = vmatprep.subr.mxu0 %v3911_v50 }
 0x328   :  { %3379 = vmatpush3.msra.mxu1 %v3921_v54  ;;  %3244 = vmatprep.mubr.msk.f32.mxu1 %vm102_vm0, %v3679_v9 }
 0x329   :  { %3376 = vmatprep.subr.mxu1 %v3927_v41 }
 0x32a   :  { %3380 = vmatpush3.msra.mxu1 %v3927_v41 }
 0x32b   :  { %3245 = vmatmul.mubr.msk.f32.vlgmr.msra.gmra.mxu1 %vm102_vm0, %v3706_v13  ;;  %3247 = vmatprep.subr.mxu1 %v2869_v6 }
 0x32c   :  { %3248 = vmatpush3.msra.mxu1 %v2869_v6 }
 0x32d   :  { %3249 = vmatprep.subr.mxu1 %v2868_v7 }
 0x32e   :  { %3250 = vmatpush3.msra.mxu1 %v2868_v7 }
 0x32f   :  { %3267 = vmatprep.subr.mxu1 %v2879_v8 }
 0x3e1   :  { %v3229_v9 = vpop.f32.mrf.mxu1 }
 0x3e2   :  { %v3243_v12 = vpop.f32.mrf.mxu0 }
 0x3e3   :  { %v1267_v13 = vpop.f32.mrf.mxu1 }
 0x3e4   :  { %v1354_v55 = vpop.f32.mrf.mxu0  ;;  %3261 = vmatprep.mubr.msk.f32.mxu0 %vm1027_vm1, %v1267_v13 }
 0x3e5   :  { %3251 = vmatprep.mubr.msk.f32.mxu1 %vm1027_vm1, %v1354_v55  ;;  %3262 = vmatmul.mubr.msk.f32.vlgmr.msra.gmra.mxu0 %vm1027_vm1, %v3229_v9 }
 0x3e6   :  { %v3232_v57 = vpop.f32.mrf.mxu1  ;;  %3252 = vmatmul.mubr.msk.f32.vlgmr.msra.gmra.mxu1 %vm1027_vm1, %v3243_v12  ;;  %3278 = vmatpush3.msra.mxu0 %v3911_v50 }
 0x3e7   :  { %3279 = vmatprep.subr.mxu0 %v3914_v53  ;;  %3268 = vmatpush3.msra.mxu1 %v2879_v8 }
 0x3e8   :  { %v1277_v58 = vpop.f32.mrf.mxu1  ;;  %3280 = vmatpush3.msra.mxu0 %v3914_v53  ;;  %3269 = vmatprep.subr.mxu1 %v2878_v56 }
 0x3e9   :  { %3264 = vmatprep.mubr.msk.f32.mxu0 %vm1027_vm1, %v1277_v58  ;;  %3281 = vmatprep.subr.mxu0 %v3921_v54 }
 0x3ea   :  { %3265 = vmatmul.mubr.msk.f32.gmra.mxu0 %vm1027_vm1, %v3232_v57  ;;  %3270 = vmatpush3.msra.mxu1 %v2878_v56 }
 0x3eb   :  { %v3246_v59 = vpop.f32.mrf.mxu1  ;;  %3282 = vmatpush3.msra.mxu0 %v3921_v54  ;;  %3285 = vmatprep.mubr.msk.f32.mxu0 %vm102_vm0, %v3759_v32  ;;  %v2889_v32 = vld [vmem:[%s4197_s5 + $0x38] sm:$0xff] }
 0x3ec   :  { %3283 = vmatprep.subr.mxu0 %v3927_v41  ;;  %3291 = vmatprep.subr.mxu1 %v2889_v32 }
 0x3ed   :  { %v1364_v60 = vpop.f32.mrf.mxu1  ;;  %3284 = vmatpush3.msra.mxu0 %v3927_v41 }
 0x3ee   :  { %3254 = vmatprep.mubr.msk.f32.mxu1 %vm1027_vm1, %v1364_v60  ;;  %3301 = vmatprep.subr.mxu0 %v3911_v50 }
 0x3ef   :  { %3255 = vmatmul.mubr.msk.f32.gmra.mxu1 %vm1027_vm1, %v3246_v59  ;;  %3286 = vmatmul.mubr.msk.f32.vlgmr.msra.gmra.mxu0 %vm102_vm0, %v3765_v33  ;;  %v2888_v33 = vld [vmem:[%s4197_s5 + $0x30] sm:$0xff] }
 0x3f0   :  { %3302 = vmatpush3.msra.mxu0 %v3911_v50  ;;  %3271 = vmatprep.mubr.msk.f32.mxu1 %vm1027_vm1, %v3927_v41 }
 0x3f1   :  { %3303 = vmatprep.subr.mxu0 %v3914_v53  ;;  %3288 = vmatprep.mubr.msk.f32.mxu0 %vm102_vm0, %v3775_v34  ;;  %v2899_v34 = vld [vmem:[%s4197_s5 + $0x48] sm:$0xff] }
 0x3f2   :  { %3304 = vmatpush3.msra.mxu0 %v3914_v53 }
 0x3f3   :  { %3305 = vmatprep.subr.mxu0 %v3921_v54  ;;  %3272 = vmatmul.mubr.msk.f32.vlgmr.msra.gmra.mxu1 %vm1027_vm1, %v3921_v54 }
 0x3f4   :  { %3289 = vmatmul.mubr.msk.f32.gmra.mxu0 %vm102_vm0, %v3790_v35  ;;  %3274 = vmatprep.mubr.msk.f32.mxu1 %vm1027_vm1, %v3914_v53 }
 0x3f5   :  { %3306 = vmatpush3.msra.mxu0 %v3921_v54  ;;  %3309 = vmatprep.mubr.msk.f32.mxu0 %vm102_vm0, %v3796_v36 }
 0x3f6   :  { %3307 = vmatprep.subr.mxu0 %v3927_v41  ;;  %3292 = vmatpush3.msra.mxu1 %v2889_v32 }
 0x3f7   :  { %3308 = vmatpush3.msra.mxu0 %v3927_v41  ;;  %3275 = vmatmul.mubr.msk.f32.gmra.mxu1 %vm1027_vm1, %v3911_v50 }
 0x3f8   :  { %3310 = vmatmul.mubr.msk.f32.vlgmr.msra.gmra.mxu0 %vm102_vm0, %v3810_v37  ;;  %3293 = vmatprep.subr.mxu1 %v2888_v33 }
 0x3f9   :  { %3312 = vmatprep.mubr.msk.f32.mxu0 %vm102_vm0, %v3816_v38  ;;  %3294 = vmatpush3.msra.mxu1 %v2888_v33 }
 0x3fa   :  { %3315 = vmatprep.subr.mxu1 %v2899_v34  ;;  %3325 = vmatprep.subr.mxu0 %v2231_v14 }
 0x3fb   :  { %3326 = vmatpush3.msra.mxu0 %v2231_v14 }
 0x3fc   :  { %3313 = vmatmul.mubr.msk.f32.gmra.mxu0 %vm102_vm0, %v3826_v39  ;;  %3327 = vmatprep.subr.mxu0 %v2230_v16 }
 0x3fd   :  { %3328 = vmatpush3.msra.mxu0 %v2230_v16 }
 0x3fe   :  { %3329 = vmatprep.subr.mxu0 %v2229_v17 }
 0x3ff   :  { %3330 = vmatpush3.msra.mxu0 %v2229_v17 }
 0x400   :  { %3331 = vmatprep.subr.mxu0 %v2228_v19 }
 0x401   :  { %3332 = vmatpush3.msra.mxu0 %v2228_v19 }
 0x4a5   :  { %v3263_v35 = vpop.f32.mrf.mxu0 }
 0x4a6   :  { %v3253_v20 = vpop.f32.mrf.mxu1 }
 0x4a7   :  { %v1551_v36 = vpop.f32.mrf.mxu0  ;;  %v1557_v26 = vadd.f32 %v3263_v35, %v3253_v20 }
 0x4a8   :  { %v1454_v21 = vpop.f32.mrf.mxu1 }
 0x4a9   :  { %v1552_v46 = vadd.f32 %v1551_v36, %v1454_v21 }
 0x4aa   :  { %v3266_v37 = vpop.f32.mrf.mxu0 }
 0x4ac   :  { %v1561_v38 = vpop.f32.mrf.mxu0 }
 0x4af   :  { %v3287_v39 = vpop.f32.mrf.mxu0  ;;  %v3256_v5 = vpop.f32.mrf.mxu1 }
 0x4b0   :  { %v1567_v31 = vadd.f32 %v3266_v37, %v3256_v5 }
 0x4b1   :  { %v1740_v61 = vpop.f32.mrf.mxu0  ;;  %v1464_v22 = vpop.f32.mrf.mxu1 }
 0x4b2   :  { %3295 = vmatprep.mubr.msk.f32.mxu1 %vm1027_vm1, %v1740_v61  ;;  %v1562_v48 = vadd.f32 %v1561_v38, %v1464_v22 }
 0x4b3   :  { %3296 = vmatmul.mubr.msk.f32.vlgmr.msra.gmra.mxu1 %vm1027_vm1, %v3287_v39  ;;  %v3273_v23 = vpop.f32.mrf.mxu1 }
 0x4b4   :  { %v3290_v63 = vpop.f32.mrf.mxu0  ;;  %3316 = vmatpush3.msra.mxu1 %v2899_v34  ;;  %v1671_v28 = vadd.f32 %v3273_v23, %v1557_v26 }
 0x4b5   :  { %3317 = vmatprep.subr.mxu1 %v2898_v62  ;;  %v1651_v24 = vpop.f32.mrf.mxu1 }
 0x4b6   :  { %v1750_v0 = vpop.f32.mrf.mxu0  ;;  %3318 = vmatpush3.msra.mxu1 %v2898_v62  ;;  %v1670_v45 = vadd.f32 %v1651_v24, %v1552_v46  ;;  %v2905_v46 = vld [vmem:[#allocation6] ss:$0 sm:$0xff] }
 0x4b7   :  { %3298 = vmatprep.mubr.msk.f32.mxu1 %vm1027_vm1, %v1750_v0  ;;  %v3276_v3 = vpop.f32.mrf.mxu1 }
 0x4b8   :  { %3299 = vmatmul.mubr.msk.f32.gmra.mxu1 %vm1027_vm1, %v3290_v63  ;;  %v3311_v1 = vpop.f32.mrf.mxu0  ;;  %v1673_v51 = vadd.f32 %v3276_v3, %v1567_v31 }
 0x4b9   :  { %v1661_v15 = vpop.f32.mrf.mxu1 }
 0x4ba   :  { %v1929_v2 = vpop.f32.mrf.mxu0  ;;  %v1672_v52 = vadd.f32 %v1661_v15, %v1562_v48  ;;  %v2904_v15 = vld [vmem:[#allocation4] ss:$0 sm:$0xff] }
 0x4bb   :  { %3319 = vmatprep.mubr.msk.f32.mxu1 %vm1027_vm1, %v1929_v2 }
 0x4bc   :  { %v3314_v4 = vpop.f32.mrf.mxu0  ;;  %3320 = vmatmul.mubr.msk.f32.vlgmr.msra.gmra.mxu1 %vm1027_vm1, %v3311_v1 }
 0x4be   :  { %v1939_v11 = vpop.f32.mrf.mxu0 }
 0x4bf   :  { %3322 = vmatprep.mubr.msk.f32.mxu1 %vm1027_vm1, %v1939_v11 }
 0x4c0   :  { %3323 = vmatmul.mubr.msk.f32.gmra.mxu1 %vm1027_vm1, %v3314_v4 }
 0x573   :  { %v3297_v25 = vpop.f32.mrf.mxu1 }
 0x574   :  { %v1860_v47 = vadd.f32 %v3297_v25, %v1671_v28 }
 0x575   :  { %v1840_v18 = vpop.f32.mrf.mxu1 }
 0x576   :  { %v1859_v44 = vadd.f32 %v1840_v18, %v1670_v45 }
 0x578   :  { %v3300_v27 = vpop.f32.mrf.mxu1 }
 0x579   :  { %v1862_v54 = vadd.f32 %v3300_v27, %v1673_v51 }
 0x57a   :  { %v1850_v29 = vpop.f32.mrf.mxu1 }
 0x57b   :  { %v1861_v41 = vadd.f32 %v1850_v29, %v1672_v52 }
 0x57c   :  { %v3321_v30 = vpop.f32.mrf.mxu1 }
 0x57d   :  { %v2049_v49 = vadd.f32 %v3321_v30, %v1860_v47 }
 0x57e   :  { %v2029_v50 = vpop.f32.mrf.mxu1 }
 0x57f   :  { %v2048_v53 = vadd.f32 %v2029_v50, %v1859_v44  ;;  %v2053_v40 = vsel %vm102_vm0, %v2049_v49, 0.0 }
 0x580   :  { %v3324_v43 = vpop.f32.mrf.mxu1 }
 0x581   :  { %v2052_v42 = vsel %vm102_vm0, %v2048_v53, 0.0  ;;  %v2051_v8 = vadd.f32 %v3324_v43, %v1862_v54 }
 0x582   :  { %v2054_v6 = vadd.f32 %v2053_v40, %v2052_v42  ;;  %v2039_v7 = vpop.f32.mrf.mxu1 }
 0x583   :  { %v2050_v9 = vadd.f32 %v2039_v7, %v1861_v41  ;;  %v2057_v55 = vsel %vm102_vm0, %v2051_v8, 0.0 }
 0x585   :  { %v2055_v12 = vsel %vm102_vm0, %v2050_v9, 0.0 }
 0x586   :  { %v2056_v13 = vadd.f32 %v2055_v12, %v2054_v6 }
 0x588   :  { %v2058_v56 = vadd.f32 %v2057_v55, %v2056_v13 }
 0x58a   :  { %v2059_v57 = vrot.slane %v2058_v56, 4 }
 0x58c   :  { %v2060_v58 = vadd.f32 %v2059_v57, %v2058_v56 }
 0x58e   :  { %v2061_v59 = vrot.slane %v2060_v58, 2 }
 0x590   :  { %v2062_v60 = vadd.f32 %v2061_v59, %v2060_v58 }
 0x592   :  { %v2063_v32 = vrot.slane %v2062_v60, 1 }
 0x594   :  { %v2064_v33 = vadd.f32 %v2063_v32, %v2062_v60 }
 0x596   :  { %v2065_v34 = vmul.f32 0.03125, %v2064_v33 }
 0x598   :  { %v2066_v35 = vsub.f32 %v2048_v53, %v2065_v34  ;;  %v2067_v36 = vsub.f32 %v2049_v49, %v2065_v34  ;;  %v2068_v37 = vsub.f32 %v2050_v9, %v2065_v34  ;;  %v2069_v38 = vsub.f32 %v2051_v8, %v2065_v34 }
 0x59a   :  { %v2070_v39 = vmul.f32 %v2066_v35, %v2066_v35  ;;  %v2071_v61 = vmul.f32 %v2067_v36, %v2067_v36  ;;  %v2072_v62 = vmul.f32 %v2068_v37, %v2068_v37  ;;  %v2073_v63 = vmul.f32 %v2069_v38, %v2069_v38 }
 0x59c   :  { %v2074_v0 = vsel %vm102_vm0, %v2070_v39, 0.0  ;;  %v2075_v1 = vsel %vm102_vm0, %v2071_v61, 0.0  ;;  %v2077_v4 = vsel %vm102_vm0, %v2072_v62, 0.0  ;;  %v2079_v14 = vsel %vm102_vm0, %v2073_v63, 0.0 }
 0x59d   :  { %v2076_v2 = vadd.f32 %v2075_v1, %v2074_v0 }
 0x59f   :  { %v2078_v11 = vadd.f32 %v2077_v4, %v2076_v2 }
 0x5a1   :  { %v2080_v16 = vadd.f32 %v2079_v14, %v2078_v11 }
 0x5a3   :  { %v2081_v17 = vrot.slane %v2080_v16, 4 }
 0x5a5   :  { %v2082_v19 = vadd.f32 %v2081_v17, %v2080_v16 }
 0x5a7   :  { %v2083_v20 = vrot.slane %v2082_v19, 2 }
 0x5a9   :  { %v2084_v21 = vadd.f32 %v2083_v20, %v2082_v19 }
 0x5ab   :  { %v2085_v5 = vrot.slane %v2084_v21, 1 }
 0x5ad   :  { %v2086_v22 = vadd.f32 %v2085_v5, %v2084_v21 }
 0x5af   :  { %v2087_v23 = vmul.f32 0.03125, %v2086_v22 }
 0x5b1   :  { %v2088_v24 = vadd.f32 1e-05, %v2087_v23 }
 0x5b3   :  { %3405 = vrsqrt.f32 %v2088_v24 }
 0x5c0   :  { %v3406_v3 = vpop.eup %3405 }
 0x5c1   :  { %v2090_v25 = vmul.f32 %v3406_v3, %v2066_v35  ;;  %v2091_v18 = vmul.f32 %v3406_v3, %v2067_v36  ;;  %v2092_v26 = vmul.f32 %v3406_v3, %v2068_v37  ;;  %v2093_v27 = vmul.f32 %v3406_v3, %v2069_v38 }
 0x5c3   :  { %v2101_v28 = vmul.f32 %v2904_v15, %v2090_v25  ;;  %v2102_v29 = vmul.f32 %v2904_v15, %v2091_v18  ;;  %v2103_v45 = vmul.f32 %v2904_v15, %v2092_v26  ;;  %v2104_v47 = vmul.f32 %v2904_v15, %v2093_v27 }
 0x5c5   :  { %v4063_v30 = vadd.f32 %v2905_v46, %v2102_v29  ;;  %v4065_v31 = vadd.f32 %v2905_v46, %v2103_v45  ;;  %v4067_v48 = vadd.f32 %v2905_v46, %v2101_v28  ;;  %v4069_v44 = vadd.f32 %v2905_v46, %v2104_v47 }
 0x5c7   :  { %v4072_v49 = vmul.f32 0.70710677, %v4063_v30  ;;  %v4075_v50 = vmul.f32 0.70710677, %v4065_v31  ;;  %v4078_v51 = vmul.f32 0.70710677, %v4067_v48 }
 0x5c8   :  { %v4084_v54 = vmul.f32 0.70710677, %v4069_v44 }
 0x5c9   :  { %v2133_v52 = vand.u32 2147483647, %v4072_v49  ;;  %v2134_v53 = vand.u32 2147483647, %v4075_v50  ;;  %v2132_v43 = vand.u32 2147483647, %v4078_v51 }
 0x5ca   :  { %v2135_v8 = vand.u32 2147483647, %v4084_v54  ;;  %vm2125_vm6 = vcmp.ge.f32.partialorder %v4072_v49, 0.0  ;;  %vm2126_vm7 = vcmp.ge.f32.partialorder %v4075_v50, 0.0  ;;  %vm2124_vm8 = vcmp.ge.f32.partialorder %v4078_v51, 0.0 }
 0x5cb   :  { %v2137_v41 = vmul.f32 0.3275911, %v2133_v52  ;;  %v2138_v40 = vmul.f32 0.3275911, %v2134_v53  ;;  %v2136_v42 = vmul.f32 0.3275911, %v2132_v43 }
 0x5cc   :  { %v2139_v12 = vmul.f32 0.3275911, %v2135_v8  ;;  %v2189_v55 = vsub.f32 0.0, %v2133_v52  ;;  %v2190_v56 = vsub.f32 0.0, %v2134_v53  ;;  %v2188_v58 = vsub.f32 0.0, %v2132_v43 }
 0x5cd   :  { %v2141_v6 = vadd.f32 1.0, %v2137_v41  ;;  %v2142_v7 = vadd.f32 1.0, %v2138_v40  ;;  %v2140_v9 = vadd.f32 1.0, %v2136_v42  ;;  %v2191_v60 = vsub.f32 0.0, %v2135_v8 }
 0x5ce   :  { %v2143_v13 = vadd.f32 1.0, %v2139_v12  ;;  %v2193_v57 = vmul.f32 %v2189_v55, %v2133_v52  ;;  %v2194_v59 = vmul.f32 %v2190_v56, %v2134_v53  ;;  %v2192_v35 = vmul.f32 %v2188_v58, %v2132_v43 }
 0x5cf   :  { %3407 = vrcp.f32 %v2141_v6  ;;  %v2195_v39 = vmul.f32 %v2191_v60, %v2135_v8  ;;  %vm2127_vm9 = vcmp.ge.f32.partialorder %v4084_v54, 0.0 }
 0x5d0   :  { %3409 = vrcp.f32 %v2142_v7  ;;  %v2198_v34 = vmul.f32 1.442695, %v2193_v57  ;;  %v2200_v37 = vmul.f32 1.442695, %v2194_v59  ;;  %v2196_v1 = vmul.f32 1.442695, %v2192_v35 }
 0x5d1   :  { %3411 = vrcp.f32 %v2140_v9  ;;  %v2202_v14 = vmul.f32 1.442695, %v2195_v39  ;;  %v2129_v57 = vsel %vm2125_vm6, 1.0, %v3525_v10 }
 0x5d2   :  { %3413 = vrcp.f32 %v2143_v13 }
 0x5d3   :  { %3415 = vpow2.f32 %v2198_v34 }
 0x5d4   :  { %3417 = vpow2.f32 %v2200_v37  ;;  %v2117_v37 = vmul.f32 0.5, %v4063_v30  ;;  %v3431_v30 = vld [vmem:[%s4192_s0 + $0x8] sm:$0xff] }
 0x5d5   :  { %3419 = vpow2.f32 %v2196_v1  ;;  %v2116_v1 = vmul.f32 0.5, %v4067_v48  ;;  %v3433_v48 = vld [vmem:[%s4192_s0 + $0x10] sm:$0xff] }
 0x5d6   :  { %3421 = vpow2.f32 %v2202_v14 }
 0x5dc   :  { %v3408_v32 = vpop.eup %3407 }
 0x5dd   :  { %v3410_v33 = vpop.eup %3409  ;;  %v2153_v36 = vmul.f32 1.0614054, %v3408_v32 }
 0x5de   :  { %v2154_v38 = vmul.f32 1.0614054, %v3410_v33  ;;  %v3412_v62 = vpop.eup %3411 }
 0x5df   :  { %v2157_v61 = vadd.f32 -1.4531521, %v2153_v36  ;;  %v2152_v0 = vmul.f32 1.0614054, %v3412_v62  ;;  %v3414_v4 = vpop.eup %3413 }
 0x5e0   :  { %v2158_v63 = vadd.f32 -1.4531521, %v2154_v38  ;;  %v2155_v19 = vmul.f32 1.0614054, %v3414_v4  ;;  %v3416_v41 = vpop.eup %3415  ;;  %v2128_v38 = vsel %vm2124_vm8, 1.0, %v3525_v10 }
 0x5e1   :  { %v2161_v2 = vmul.f32 %v3408_v32, %v2157_v61  ;;  %v2156_v16 = vadd.f32 -1.4531521, %v2152_v0  ;;  %v3418_v42 = vpop.eup %3417  ;;  %v2118_v0 = vmul.f32 0.5, %v4065_v31 }
 0x5e2   :  { %v2162_v11 = vmul.f32 %v3410_v33, %v2158_v63  ;;  %v2159_v22 = vadd.f32 -1.4531521, %v2155_v19  ;;  %v3420_v56 = vpop.eup %3419  ;;  %v2131_v63 = vsel %vm2127_vm9, 1.0, %v3525_v10 }
 0x5e3   :  { %v2165_v17 = vadd.f32 1.4214138, %v2161_v2  ;;  %v2160_v21 = vmul.f32 %v3412_v62, %v2156_v16 }
 0x5e4   :  { %v2166_v20 = vadd.f32 1.4214138, %v2162_v11  ;;  %v2163_v15 = vmul.f32 %v3414_v4, %v2159_v22  ;;  %v2906_v22 = vld [vmem:[#allocation7] ss:$0 sm:$0xff] }
 0x5e5   :  { %v2169_v5 = vmul.f32 %v3408_v32, %v2165_v17  ;;  %v2164_v24 = vadd.f32 1.4214138, %v2160_v21  ;;  %v2119_v17 = vmul.f32 0.5, %v4069_v44  ;;  %v3434_v44 = vld [vmem:[%s4192_s0 + $0x18] sm:$0xff] }
 0x5e6   :  { %v2170_v23 = vmul.f32 %v3410_v33, %v2166_v20  ;;  %v2167_v27 = vadd.f32 1.4214138, %v2163_v15 }
 0x5e7   :  { %v2173_v3 = vadd.f32 -0.28449672, %v2169_v5  ;;  %v2168_v18 = vmul.f32 %v3412_v62, %v2164_v24 }
 0x5e8   :  { %v2174_v25 = vadd.f32 -0.28449672, %v2170_v23  ;;  %v2171_v45 = vmul.f32 %v3414_v4, %v2167_v27 }
 0x5e9   :  { %v2177_v26 = vmul.f32 %v3408_v32, %v2173_v3  ;;  %v2172_v28 = vadd.f32 -0.28449672, %v2168_v18 }
 0x5ea   :  { %v2178_v46 = vmul.f32 %v3410_v33, %v2174_v25  ;;  %v2175_v43 = vadd.f32 -0.28449672, %v2171_v45 }
 0x5eb   :  { %v2181_v29 = vadd.f32 0.2548296, %v2177_v26  ;;  %v2176_v52 = vmul.f32 %v3412_v62, %v2172_v28 }
 0x5ec   :  { %v2182_v47 = vadd.f32 0.2548296, %v2178_v46  ;;  %v2179_v8 = vmul.f32 %v3414_v4, %v2175_v43 }
 0x5ed   :  { %v2185_v53 = vmul.f32 %v3408_v32, %v2181_v29  ;;  %v2180_v6 = vadd.f32 0.2548296, %v2176_v52  ;;  %v2130_v32 = vsel %vm2126_vm7, 1.0, %v3525_v10  ;;  %v3432_v10 = vld [vmem:[%s4192_s0] sm:$0xff] }
 0x5ee   :  { %v2186_v40 = vmul.f32 %v3410_v33, %v2182_v47  ;;  %v2183_v55 = vadd.f32 0.2548296, %v2179_v8  ;;  %v3422_v33 = vpop.eup %3421 }
 0x5ef   :  { %v2205_v7 = vmul.f32 %v3416_v41, %v2185_v53  ;;  %v2184_v12 = vmul.f32 %v3412_v62, %v2180_v6  ;;  %v2377_v6 = vld [vmem:[%s4202_s10] sm:$0xf] }
 0x5f0   :  { %v2206_v9 = vmul.f32 %v3418_v42, %v2186_v40  ;;  %v2187_v49 = vmul.f32 %v3414_v4, %v2183_v55  ;;  %3339 = vmatprep.subr.msk.mxu1 %vm2398_vm11, %v2377_v6 }
 0x5f1   :  { %v2209_v13 = vsub.f32 1.0, %v2205_v7  ;;  %v2204_v59 = vmul.f32 %v3420_v56, %v2184_v12  ;;  %v2487_v7 = vld [vmem:[%s4203_s11] sm:$0xf]  ;;  %3340 = vmatpush3.msk.msra.mxu1 %vm2398_vm11, %v2377_v6 }
 0x5f2   :  { %v2210_v58 = vsub.f32 1.0, %v2206_v9  ;;  %v2207_v50 = vmul.f32 %v3422_v33, %v2187_v49  ;;  %3347 = vmatprep.subr.msk.mxu0 %vm2398_vm11, %v2487_v7  ;;  %v2582_v56 = vld [vmem:[%s4205_s13] sm:$0x7]  ;;  %v2581_v49 = vld [vmem:[%s4204_s12 + $0x8] sm:$0xff] }
 0x5f3   :  { %v2213_v60 = vmul.f32 %v2209_v13, %v2129_v57  ;;  %v2208_v35 = vsub.f32 1.0, %v2204_v59  ;;  %3355 = vmatprep.subr.msk.mxu1 %vm2596_vm12, %v2582_v56 }
 0x5f4   :  { %v2214_v34 = vmul.f32 %v2210_v58, %v2130_v32  ;;  %v2211_v51 = vsub.f32 1.0, %v2207_v50 }
 0x5f5   :  { %v2217_v36 = vadd.f32 1.0, %v2213_v60  ;;  %v2212_v39 = vmul.f32 %v2208_v35, %v2128_v38  ;;  %v2580_v38 = vld [vmem:[%s4204_s12] sm:$0xff] }
 0x5f6   :  { %v2218_v61 = vadd.f32 1.0, %v2214_v34  ;;  %v2215_v4 = vmul.f32 %v2211_v51, %v2131_v63 }
 0x5f7   :  { %v2221_v62 = vmul.f32 %v2217_v36, %v2117_v37  ;;  %v2216_v2 = vadd.f32 1.0, %v2212_v39 }
 0x5f8   :  { %v2222_v14 = vmul.f32 %v2218_v61, %v2118_v0  ;;  %v2219_v54 = vadd.f32 1.0, %v2215_v4 }
 0x5f9   :  { %v2220_v11 = vmul.f32 %v2216_v2, %v2116_v1  ;;  %v2225_v16 = vadd.f32 %v3431_v30, %v2221_v62 }
 0x5fa   :  { %v2223_v31 = vmul.f32 %v2219_v54, %v2119_v17  ;;  %v2226_v20 = vadd.f32 %v3433_v48, %v2222_v14 }
 0x5fb   :  { %v2224_v19 = vadd.f32 %v3432_v10, %v2220_v11 }
 0x5fc   :  { %v2227_v21 = vadd.f32 %v3434_v44, %v2223_v31 }
 0x5fd   :  { %3333 = vmatprep.mubr.msk.f32.mxu0 %vm102_vm0, %v2224_v19 }
 0x5fe   :  { %3334 = vmatmul.mubr.msk.f32.vlgmr.msra.gmra.mxu0 %vm102_vm0, %v2225_v16 }
 0x5ff   :  { %3336 = vmatprep.mubr.msk.f32.mxu0 %vm102_vm0, %v2226_v20  ;;  %3348 = vmatpush3.msk.msra.mxu0 %vm2398_vm11, %v2487_v7 }
 0x600   :  { %3363 = vmatprep.subr.mxu0 %v2581_v49 }
 0x602   :  { %3337 = vmatmul.mubr.msk.f32.gmra.mxu0 %vm102_vm0, %v2227_v21 }
 0x6be   :  { %v3335_v5 = vpop.f32.mrf.mxu0 }
 0x6bf   :  { %v4117_v15 = vadd.f32 %v3335_v5, %v2906_v22 }
 0x6c0   :  { %v2317_v23 = vpop.f32.mrf.mxu0 }
 0x6c1   :  { %v4115_v24 = vadd.f32 %v2906_v22, %v2317_v23  ;;  %v2337_v28 = vmul.f32 %v4117_v15, %v4117_v15 }
 0x6c2   :  { %v3338_v3 = vpop.f32.mrf.mxu0 }
 0x6c3   :  { %v2336_v25 = vmul.f32 %v4115_v24, %v4115_v24  ;;  %v4124_v27 = vadd.f32 %v3338_v3, %v2906_v22 }
 0x6c4   :  { %v2327_v18 = vpop.f32.mrf.mxu0 }
 0x6c5   :  { %v4121_v26 = vadd.f32 %v2906_v22, %v2327_v18  ;;  %2344 = vrot.lane.b32.xlu0 %v2336_v25, %s3526_s26  ;;  %v2339_v29 = vmul.f32 %v4124_v27, %v4124_v27 }
 0x6c7   :  { %v2338_v46 = vmul.f32 %v4121_v26, %v4121_v26 }
 0x6c9   :  { %2348 = vrot.lane.b32.xlu1 %v2338_v46, %s3526_s26  ;;  %2346 = vrot.lane.b32.xlu0 %v2337_v28, %s3526_s26 }
 0x6cd   :  { %2350 = vrot.lane.b32.xlu1 %v2339_v29, %s3526_s26 }
 0x737   :  { %v2345_v45 = vpop.permute.xlu0 %2344 }
 0x738   :  { %v2357_v47 = vsel %vm2356_vm10, %v2345_v45, 0.0 }
 0x739   :  { %2358 = vadd.xlane.f32.xlu0 %v2357_v47 }
 0x73b   :  { %v2349_v52 = vpop.permute.xlu1 %2348  ;;  %v2347_v53 = vpop.permute.xlu0 %2346 }
 0x73c   :  { %v2363_v43 = vsel %vm2356_vm10, %v2349_v52, 0.0  ;;  %v2360_v41 = vsel %vm2356_vm10, %v2347_v53, 0.0 }
 0x73d   :  { %2364 = vadd.xlane.f32.xlu0 %v2363_v43  ;;  %2361 = vadd.xlane.f32.xlu1 %v2360_v41 }
 0x73f   :  { %v2351_v40 = vpop.permute.xlu1 %2350 }
 0x740   :  { %v2366_v42 = vsel %vm2356_vm10, %v2351_v40, 0.0 }
 0x741   :  { %2367 = vadd.xlane.f32.xlu0 %v2366_v42 }
 0x7c2   :  { %v2359_v8 = vpop.xlane.xlu0 %2358 }
 0x7c3   :  { %3423 = vrsqrt.f32 %v2359_v8 }
 0x7c6   :  { %v2362_v9 = vpop.xlane.xlu1 %2361  ;;  %v2365_v12 = vpop.xlane.xlu0 %2364 }
 0x7c7   :  { %3425 = vrsqrt.f32 %v2362_v9 }
 0x7c8   :  { %3427 = vrsqrt.f32 %v2365_v12 }
 0x7ca   :  { %v2368_v13 = vpop.xlane.xlu0 %2367 }
 0x7cb   :  { %3429 = vrsqrt.f32 %v2368_v13 }
 0x7d0   :  { %v3424_v55 = vpop.eup %3423 }
 0x7d1   :  { %v2373_v57 = vmul.f32 %v3424_v55, %v4115_v24 }
 0x7d3   :  { %2382 = vrot.lane.b32.xlu1 %v2373_v57, %s3526_s26 }
 0x7d4   :  { %v3426_v58 = vpop.eup %3425 }
 0x7d5   :  { %v3428_v59 = vpop.eup %3427  ;;  %v2374_v60 = vmul.f32 %v3426_v58, %v4117_v15 }
 0x7d6   :  { %v2375_v32 = vmul.f32 %v3428_v59, %v4121_v26 }
 0x7d7   :  { %2384 = vrot.lane.b32.xlu0 %v2374_v60, %s3526_s26 }
 0x7d8   :  { %v3430_v33 = vpop.eup %3429  ;;  %2386 = vrot.lane.b32.xlu1 %v2375_v32, %s3526_s26 }
 0x7d9   :  { %v2376_v34 = vmul.f32 %v3430_v33, %v4124_v27 }
 0x7dc   :  { %2388 = vrot.lane.b32.xlu1 %v2376_v34, %s3526_s26 }
 0x845   :  { %v2383_v35 = vpop.permute.xlu1 %2382 }
 0x846   :  { %3341 = vmatprep.mubr.msk.f32.mxu1 %vm2356_vm10, %v2383_v35  ;;  %3349 = vmatprep.mubr.msk.f32.mxu0 %vm2356_vm10, %v2383_v35 }
 0x849   :  { %v2385_v36 = vpop.permute.xlu0 %2384 }
 0x84a   :  { %v2387_v50 = vpop.permute.xlu1 %2386  ;;  %3342 = vmatmul.mubr.msk.f32.vlgmr.msra.gmra.mxu1 %vm2356_vm10, %v2385_v36  ;;  %3350 = vmatmul.mubr.msk.f32.vlgmr.msra.gmra.mxu0 %vm2356_vm10, %v2385_v36 }
 0x84b   :  { %3344 = vmatprep.mubr.msk.f32.mxu1 %vm2356_vm10, %v2387_v50  ;;  %3352 = vmatprep.mubr.msk.f32.mxu0 %vm2356_vm10, %v2387_v50 }
 0x84c   :  { %3356 = vmatpush3.msk.msra.mxu1 %vm2596_vm12, %v2582_v56  ;;  %3364 = vmatpush3.msra.mxu0 %v2581_v49 }
 0x84d   :  { %3365 = vmatprep.subr.mxu0 %v2580_v38 }
 0x84e   :  { %v2389_v37 = vpop.permute.xlu1 %2388  ;;  %3366 = vmatpush3.msra.mxu0 %v2580_v38 }
 0x84f   :  { %3345 = vmatmul.mubr.msk.f32.gmra.mxu1 %vm2356_vm10, %v2389_v37  ;;  %3353 = vmatmul.mubr.msk.f32.gmra.mxu0 %vm2356_vm10, %v2389_v37 }
 0x850   :  { %3357 = vmatprep.mubr.msk.f32.mxu1 %vm2583_vm13, %v4115_v24 }
 0x853   :  { %3358 = vmatmul.mubr.msk.f32.vlgmr.msra.gmra.mxu1 %vm2583_vm13, %v4117_v15 }
 0x854   :  { %3360 = vmatprep.mubr.msk.f32.mxu1 %vm2583_vm13, %v4121_v26 }
 0x857   :  { %3361 = vmatmul.mubr.msk.f32.gmra.mxu1 %vm2583_vm13, %v4124_v27 }
 0x90a   :  { %v3343_v39 = vpop.f32.mrf.mxu1  ;;  %v3351_v61 = vpop.f32.mrf.mxu0 }
 0x90b   :  { %v2577_v0 = vmul.f32 %v3351_v61, %v3343_v39 }
 0x90c   :  { %v2468_v51 = vpop.f32.mrf.mxu1  ;;  %v2557_v62 = vpop.f32.mrf.mxu0 }
 0x90d   :  { %v2576_v63 = vmul.f32 %v2557_v62, %v2468_v51 }
 0x90f   :  { %v3346_v1 = vpop.f32.mrf.mxu1  ;;  %v3354_v2 = vpop.f32.mrf.mxu0  ;;  %3367 = vmatprep.mubr.msk.f32.mxu0 %vm1027_vm1, %v2576_v63 }
 0x910   :  { %3368 = vmatmul.mubr.msk.f32.vlgmr.msra.gmra.mxu0 %vm1027_vm1, %v2577_v0  ;;  %v2579_v54 = vmul.f32 %v3354_v2, %v3346_v1 }
 0x911   :  { %v2478_v4 = vpop.f32.mrf.mxu1  ;;  %v2567_v11 = vpop.f32.mrf.mxu0 }
 0x912   :  { %v2578_v14 = vmul.f32 %v2567_v11, %v2478_v4 }
 0x913   :  { %v3359_v30 = vpop.f32.mrf.mxu1 }
 0x914   :  { %3370 = vmatprep.mubr.msk.f32.mxu0 %vm1027_vm1, %v2578_v14 }
 0x915   :  { %3371 = vmatmul.mubr.msk.f32.gmra.mxu0 %vm1027_vm1, %v2579_v54  ;;  %v2666_v16 = vpop.f32.mrf.mxu1 }
 0x917   :  { %v3362_v31 = vpop.f32.mrf.mxu1 }
 0x919   :  { %v2676_v21 = vpop.f32.mrf.mxu1 }
 0x9d0   :  { %v3369_v17 = vpop.f32.mrf.mxu0 }
 0x9d1   :  { %v2769_v10 = vadd.f32 %v3369_v17, %v3359_v30 }
 0x9d2   :  { %v2763_v19 = vpop.f32.mrf.mxu0 }
 0x9d3   :  { %2784 = vst.msk [vmem:[%s4206_s14 + $0x8] sm:$0xff] %vm2782_vm14, %v2769_v10  ;;  %v2764_v48 = vadd.f32 %v2763_v19, %v2666_v16 }
 0x9d5   :  { %2783 = vst.msk [vmem:[%s4206_s14] sm:$0xff] %vm2782_vm14, %v2764_v48  ;;  %v3372_v20 = vpop.f32.mrf.mxu0 }
 0x9d6   :  { %v2779_v44 = vadd.f32 %v3372_v20, %v3362_v31 }
 0x9d7   :  { %v2773_v5 = vpop.f32.mrf.mxu0 }
 0x9d8   :  { %2786 = vst.msk [vmem:[%s4206_s14 + $0x18] sm:$0xff] %vm2782_vm14, %v2779_v44  ;;  %v2774_v22 = vadd.f32 %v2773_v5, %v2676_v21 }
 0x9da   :  { %2785 = vst.msk [vmem:[%s4206_s14 + $0x10] sm:$0xff] %vm2782_vm14, %v2774_v22 }
 0x9db   :  { %2791 = vsyncpa [#allocation3], 1 }
 0x9dc   :  { %2792 = vsyncpa [#allocation5], 1 }
 0x9dd   :  { %2793 = vsyncpa [#allocation8], 1 }

</bundles_post_ra>
